<compile_context>
chip_gen: v6e
topology: v6e:2x2x1
jax: 0.10.0
libtpu: 0.0.40
codegen_flags: <defaults>
</compile_context>

<pallas_src>
import numpy as np
import jax
import jax.numpy as jnp
from jax.experimental import pallas as pl
from jax.experimental.pallas import tpu as pltpu

KS = 21              # kernel size
STRIDE = 32          # conv stride ("factor" in the PyTorch module)
PAD = (KS - 1) // 2  # = 10, replication padding

_VMEM_BUDGET_BYTES = 12 * 1024 * 1024   # conservative across v5e/v6e/v7x


# ----------------------------------------------------------------------------
# Setup-time (numpy) parameter construction — runs once, outside jit.
# ----------------------------------------------------------------------------
def anisotropic_gaussian_kernel(k_size, scale_factor, lambda_1, lambda_2, theta):
    """Deterministic anisotropic Gaussian blur kernel (numpy, setup-time only)."""
    LAMBDA = np.diag([lambda_1, lambda_2]).astype(np.float64)
    Q = np.array([[np.cos(theta), -np.sin(theta)],
                  [np.sin(theta), np.cos(theta)]], dtype=np.float64)
    SIGMA = Q @ LAMBDA @ Q.T
    INV_SIGMA = np.linalg.inv(SIGMA)[None, None, :, :]
    MU = ((k_size - 1) / 2.0).astype(np.float64)[None, None, :, None]
    X, Y = np.meshgrid(np.arange(k_size[0]), np.arange(k_size[1]))
    Z = np.stack([X, Y], axis=2)[:, :, :, None].astype(np.float64)
    ZZ = Z - MU
    ZZ_t = ZZ.transpose(0, 1, 3, 2)
    raw = np.exp(-0.5 * np.squeeze(ZZ_t @ INV_SIGMA @ ZZ))
    return raw / np.sum(raw)


def _effective_weights_np(weight, H, W):
    """Fold ReplicationPad2d(PAD) + KSxKS/STRIDE cross-correlation into one
    (H*W, Ho*Wo) matrix acting on the *unpadded* image.

    Padded pixel (py, px) reads original pixel (clip(py-PAD,0,H-1),
    clip(px-PAD,0,W-1)); each filter tap is therefore accumulated onto the
    clipped source pixel of its output position.  Pure numpy, setup-time only.
    """
    Hp, Wp = H + 2 * PAD, W + 2 * PAD
    Ho = (Hp - KS) // STRIDE + 1
    Wo = (Wp - KS) // STRIDE + 1
    w = np.asarray(weight, dtype=np.float64)
    ky, kx = np.meshgrid(np.arange(KS), np.arange(KS), indexing="ij")
    ky, kx, wf = ky.ravel(), kx.ravel(), w.ravel()
    k_eff = np.zeros((H * W, Ho * Wo), dtype=np.float32)
    for oy in range(Ho):
        for ox in range(Wo):
            rows = np.clip(oy * STRIDE + ky - PAD, 0, H - 1)
            cols = np.clip(ox * STRIDE + kx - PAD, 0, W - 1)
            img = np.zeros((H, W), dtype=np.float64)
            np.add.at(img, (rows, cols), wf)
            k_eff[:, oy * Wo + ox] = img.reshape(-1)
    return k_eff, Ho, Wo


def _round_up(x, m):
    return ((x + m - 1) // m) * m


def _choose_tiles(C, K, Npad, budget=_VMEM_BUDGET_BYTES):
    """Pick (channel block cb, reduction tile tk) from a VMEM budget."""
    # Channel block: full C when small; otherwise a multiple of 8, capped so
    # that large C gives >= 2 blocks (v7x has 2 TensorCores per chip).
    if C <= 256:
        cb = C
    else:
        cb = min(256, _round_up((C + 1) // 2, 8))

    def working_set(cb_, tk_):
        return 4 * (2 * cb_ * tk_        # x blocks (double-buffered)
                    + 2 * tk_ * Npad     # K_eff blocks (double-buffered)
                    + 2 * cb_ * Npad     # output blocks (double-buffered)
                    + cb_ * Npad)        # f32 accumulator scratch

    # Reduction tile over H*W: full K when it fits, else a multiple of 128.
    tk = K
    while working_set(cb, tk) > budget and tk > 128:
        tk = _round_up(max(128, tk // 2), 128)
    while working_set(cb, tk) > budget and cb > 8:
        cb = _round_up(max(8, cb // 2), 8)
    return cb, tk


# ----------------------------------------------------------------------------
# Pallas kernel: one lane-dense MXU matmul (+ bias) with a K-reduction axis.
# ----------------------------------------------------------------------------
def _hsi_kernel(x_ref, k_ref, b_ref, o_ref, acc_ref):
    # x_ref : (cb, tk)     channel-block rows of the flattened image    (VMEM)
    # k_ref : (tk, Npad)   folded pad+conv weights, lane-dense          (VMEM)
    # b_ref : (1,)         conv bias                                    (SMEM)
    # o_ref : (cb, Npad)   per-channel outputs, lane-dense              (VMEM)
    # acc_ref: (cb, Npad)  f32 accumulator scratch                      (VMEM)
    @pl.when(pl.program_id(1) == 0)
    def _():
        acc_ref[...] = jnp.zeros_like(acc_ref)

    # f32 in / f32 accumulation on the MXU; matches the f32 reference to 1e-5.
    acc_ref[...] += jnp.dot(x_ref[...], k_ref[...],
                            preferred_element_type=jnp.float32)

    @pl.when(pl.program_id(1) == pl.num_programs(1) - 1)
    def _():
        o_ref[...] = (acc_ref[...] + b_ref[0]).astype(o_ref.dtype)


def build_hsi_channel(weight_np, H, W, C):
    """Builds K_eff once (numpy) and returns (jitted forward, K_eff device
    array, (Ho, Wo)).  forward(x, k_eff, bias) -> (1, C, Ho, Wo)."""
    k_eff, Ho, Wo = _effective_weights_np(weight_np, H, W)   # (H*W, Ho*Wo)
    K = H * W
    N = Ho * Wo
    Npad = _round_up(N, 128)                  # lane-dense RHS / output
    cb, tk = _choose_tiles(C, K, Npad)
    Kpad = _round_up(K, tk)
    n_cb = pl.cdiv(C, cb)
    n_kb = Kpad // tk

    # Zero-pad K_eff: extra lanes and extra reduction rows contribute nothing.
    k_pad = np.zeros((Kpad, Npad), dtype=np.float32)
    k_pad[:K, :N] = k_eff
    k_eff_dev = jnp.asarray(k_pad)

    cost = pl.CostEstimate(
        flops=2 * C * Kpad * Npad,
        transcendentals=0,
        bytes_accessed=4 * (C * Kpad + n_cb * Kpad * Npad + C * Npad),
    )

    call = pl.pallas_call(
        _hsi_kernel,
        out_shape=jax.ShapeDtypeStruct((C, Npad), jnp.float32),
        grid=(n_cb, n_kb),
        in_specs=[
            pl.BlockSpec((cb, tk), lambda i, k: (i, k)),
            # NOTE: K_eff's block index is constant across the channel axis
            # when n_kb == 1, so it is fetched once; single-buffering it
            # (pl.Buffered(1)) would save one VMEM copy but is left at the
            # default for maximum lowering portability.
            pl.BlockSpec((tk, Npad), lambda i, k: (k, 0)),
            pl.BlockSpec(memory_space=pltpu.MemorySpace.SMEM),
        ],
        out_specs=pl.BlockSpec((cb, Npad), lambda i, k: (i, 0)),
        scratch_shapes=[pltpu.VMEM((cb, Npad), jnp.float32)],
        compiler_params=pltpu.CompilerParams(
            dimension_semantics=("parallel", "arbitrary"),
            vmem_limit_bytes=32 * 1024 * 1024),
        cost_estimate=cost,
    )

    @jax.jit
    def forward(x, k_eff_arg, bias):
        # Only batch element 0 is used, exactly like the PyTorch module.
        x_flat = x[0].reshape(C, K).astype(jnp.float32)      # lane-dense rows
        if Kpad > K:                                         # only if tiled K
            x_flat = jnp.pad(x_flat, ((0, 0), (0, Kpad - K)))
        b1 = jnp.reshape(bias, (1,)).astype(jnp.float32)
        out = call(x_flat, k_eff_arg, b1)                    # (C, Npad)
        return out[:, :N].reshape(C, Ho, Wo)[None]           # (1, C, Ho, Wo)

    return forward, k_eff_dev, (Ho, Wo)


# ----------------------------------------------------------------------------
# Pure-JAX reference (replication pad + strided conv) for verification.
# ----------------------------------------------------------------------------
def _reference(x, weight, bias):
    x0 = x[0]
    xp = jnp.pad(x0, ((0, 0), (PAD, PAD), (PAD, PAD)), mode="edge")
    ref = jax.lax.conv_general_dilated(
        xp[:, None],                  # (C, 1, Hp, Wp) — channels as batch
        weight[None, None],           # (1, 1, KS, KS) OIHW
        window_strides=(STRIDE, STRIDE),
        padding="VALID",
        dimension_numbers=("NCHW", "OIHW", "NCHW"),
    ) + bias
    return ref[:, 0][None]            # (1, C, Ho, Wo)


if __name__ == "__main__":
    key = jax.random.PRNGKey(0)
    kx_, kb_ = jax.random.split(key)

    B, C, H, W = 2, 4, 64, 64
    x = jax.random.uniform(kx_, (B, C, H, W), dtype=jnp.float32)

    # Deterministic parameters (shapes from HSIchannel.__init__).
    theta = 0.37 * np.pi  # deterministic stand-in for np.random.rand() * pi
    w_np = anisotropic_gaussian_kernel(
        np.array([KS, KS]), np.array([STRIDE, STRIDE]),
        0.175 * STRIDE, 2.5 * STRIDE, theta).astype(np.float32)   # (21, 21)
    # Conv2d default bias init: U(-1/sqrt(fan_in), 1/sqrt(fan_in)), fan_in=441.
    bias = jax.random.uniform(kb_, (), jnp.float32, -1.0 / 21.0, 1.0 / 21.0)

    forward, k_eff_dev, (Ho, Wo) = build_hsi_channel(w_np, H, W, C)

    out = jax.block_until_ready(forward(x, k_eff_dev, bias))
    ref = jax.block_until_ready(_reference(x, jnp.asarray(w_np), bias))

    assert out.shape == (1, C, Ho, Wo), out.shape
    assert jnp.allclose(out, ref, rtol=1e-4, atol=1e-5), float(
        jnp.max(jnp.abs(out - ref)))

    print("KERNEL_OK")
</pallas_src>

<mosaic_0001>
module attributes {stable_mosaic.version = 11 : i64} {
  func.func @_hsi_kernel(%arg0: i32, %arg1: i32, %arg2: memref<4x4096xf32, #tpu.memory_space<vmem>>, %arg3: memref<4096x128xf32, #tpu.memory_space<vmem>>, %arg4: memref<1xf32, #tpu.memory_space<smem>>, %arg5: memref<4x128xf32, #tpu.memory_space<vmem>>, %arg6: memref<4x128xf32, #tpu.memory_space<vmem>>) attributes {dimension_semantics = [#tpu.dimension_semantics<parallel>, #tpu.dimension_semantics<arbitrary>], iteration_bounds = array<i64: 1, 1>, scalar_prefetch = 0 : i64, scratch_operands = 1 : i64, tpu.core_type = #tpu.core_type<tc>, window_params = [{transform_indices = @transform_0, window_bounds = array<i64: 4, 4096>}, {transform_indices = @transform_1, window_bounds = array<i64: 4096, 128>}, {transform_indices = @transform_2, window_bounds = array<i64: 1>}, {transform_indices = @transform_3, window_bounds = array<i64: 4, 128>}]} {
    %c0_i32 = arith.constant 0 : i32
    %0 = arith.cmpi eq, %arg1, %c0_i32 : i32
    %1 = arith.extui %0 : i1 to i32
    %c0_i32_0 = arith.constant 0 : i32
    %2 = arith.cmpi ne, %1, %c0_i32_0 : i32
    scf.if %2 {
      %cst_10 = arith.constant 0.000000e+00 : f32
      %12 = vector.broadcast %cst_10 : f32 to vector<4x128xf32>
      %c0_11 = arith.constant 0 : index
      %c0_12 = arith.constant 0 : index
      %13 = vector.load %arg6[%c0_11, %c0_12] : memref<4x128xf32, #tpu.memory_space<vmem>>, vector<4x128xf32>
      tpu.vector_store %arg6[%c0_11, %c0_12], %12 {strides = array<i32>} : memref<4x128xf32, #tpu.memory_space<vmem>>, vector<4x128xf32>,
    } else {
    }
    %c0 = arith.constant 0 : index
    %c0_1 = arith.constant 0 : index
    %3 = vector.load %arg6[%c0, %c0_1] : memref<4x128xf32, #tpu.memory_space<vmem>>, vector<4x128xf32>
    %c0_2 = arith.constant 0 : index
    %c0_3 = arith.constant 0 : index
    %4 = vector.load %arg2[%c0_2, %c0_3] : memref<4x4096xf32, #tpu.memory_space<vmem>>, vector<4x4096xf32>
    %c0_4 = arith.constant 0 : index
    %c0_5 = arith.constant 0 : index
    %5 = vector.load %arg3[%c0_4, %c0_5] : memref<4096x128xf32, #tpu.memory_space<vmem>>, vector<4096x128xf32>
    %cst = arith.constant dense<0.000000e+00> : vector<4x128xf32>
    %6 = tpu.matmul %4, %5, %cst {dimension_numbers = #tpu.dot_dimension_numbers<[1], [0], [0], [1], [0, 0, 1, 1], [], []>} : vector<4x4096xf32>, vector<4096x128xf32>, vector<4x128xf32> -> vector<4x128xf32>
    %7 = arith.addf %3, %6 : vector<4x128xf32>
    %c0_6 = arith.constant 0 : index
    %c0_7 = arith.constant 0 : index
    %8 = vector.load %arg6[%c0_6, %c0_7] : memref<4x128xf32, #tpu.memory_space<vmem>>, vector<4x128xf32>
    tpu.vector_store %arg6[%c0_6, %c0_7], %7 {strides = array<i32>} : memref<4x128xf32, #tpu.memory_space<vmem>>, vector<4x128xf32>,
    %c0_i32_8 = arith.constant 0 : i32
    %9 = arith.cmpi eq, %arg1, %c0_i32_8 : i32
    %10 = arith.extui %9 : i1 to i32
    %c0_i32_9 = arith.constant 0 : i32
    %11 = arith.cmpi ne, %10, %c0_i32_9 : i32
    scf.if %11 {
      %c0_10 = arith.constant 0 : index
      %c0_11 = arith.constant 0 : index
      %12 = vector.load %arg6[%c0_10, %c0_11] : memref<4x128xf32, #tpu.memory_space<vmem>>, vector<4x128xf32>
      %c0_12 = arith.constant 0 : index
      %13 = memref.load %arg4[%c0_12] : memref<1xf32, #tpu.memory_space<smem>>
      %14 = vector.broadcast %13 : f32 to vector<4x128xf32>
      %15 = arith.addf %12, %14 : vector<4x128xf32>
      %c0_13 = arith.constant 0 : index
      %c0_14 = arith.constant 0 : index
      %16 = vector.load %arg5[%c0_13, %c0_14] : memref<4x128xf32, #tpu.memory_space<vmem>>, vector<4x128xf32>
      tpu.vector_store %arg5[%c0_13, %c0_14], %15 {strides = array<i32>} : memref<4x128xf32, #tpu.memory_space<vmem>>, vector<4x128xf32>,
    } else {
    }
    return
  }
  func.func @transform_0(%arg0: i32, %arg1: i32) -> (i32, i32) {
    %c0_i32 = arith.constant 0 : i32
    return %arg0, %arg1 : i32, i32
  }
  func.func @transform_1(%arg0: i32, %arg1: i32) -> (i32, i32) {
    %c0_i32 = arith.constant 0 : i32
    %c0_i32_0 = arith.constant 0 : i32
    return %arg1, %c0_i32 : i32, i32
  }
  func.func @transform_2(%arg0: i32, %arg1: i32) -> i32 {
    %c0_i32 = arith.constant 0 : i32
    %c0_i32_0 = arith.constant 0 : i32
    return %c0_i32 : i32
  }
  func.func @transform_3(%arg0: i32, %arg1: i32) -> (i32, i32) {
    %c0_i32 = arith.constant 0 : i32
    %c0_i32_0 = arith.constant 0 : i32
    return %arg0, %c0_i32 : i32, i32
  }
}

</mosaic_0001>

<bundles_post_ra>
// kernel: squeeze.1
= control target key start
LH: loop header
LB: loop body
LE: loop exit
PB: predicated region body
PF: predicated region fallthrough
CT: control target
= control target key end

     0   :  { %vm115_vm0 = vcmask 1041409   ;;  %vm119_vm1 = vcmask 1042434   ;;  %vm124_vm2 = vcmask 1044483   ;;  %vm128_vm3 = vcmask 1045509   ;;  %s189_s6 = smov 24  ;;  %s122_s27 = smov 24  ;;  %s1734_s0 = inlined_call_operand.vmem [shape: f32[1,4,64,64], index: 0, kind: input, shape index: {}]   ;;  %s1735_s1 = inlined_call_operand.vmem [shape: f32[4,4096], index: 1, kind: output, shape index: {}]  }
   0x1   :  { %vm132_vm4 = vcmask 1046534   ;;  %vm136_vm5 = vcmask 1047559   ;;  %v937_v0 = vld [vmem:[%s1734_s0 + $0x11] sm:$0x1]   ;;  %v941_v5 = vld [vmem:[%s1734_s0 + $0x4e] sm:$0x20]  }
   0x2   :  { %v938_v1 = vld [vmem:[%s1734_s0 + $0x50] sm:$0x2]   ;;  %v942_v7 = vld [vmem:[%s1734_s0 + $0x8d] sm:$0x40]   ;;  %v923_v9 = vld [vmem:[%s1734_s0 + $0x1] sm:$0x1]  }
   0x3   :  { %v183_v2 = vsel %vm115_vm0, %v938_v1, %v937_v0  ;;  %v939_v3 = vld [vmem:[%s1734_s0 + $0x8f] sm:$0x4]   ;;  %v943_v8 = vld [vmem:[%s1734_s0 + $0xcc] sm:$0x80]   ;;  %v924_v11 = vld [vmem:[%s1734_s0 + $0x40] sm:$0x2]  }
   0x4   :  { %v940_v4 = vld [vmem:[%s1734_s0 + $0x30b] ss:$-190 sm:%s189_s6]   ;;  %v187_v6 = vsel %vm119_vm1, %v939_v3, %v183_v2  ;;  %v925_v12 = vld [vmem:[%s1734_s0 + $0x7f] sm:$0x4]   ;;  %s223_s28 = smov 24  ;;  %v116_v14 = vsel %vm115_vm0, %v924_v11, %v923_v9  ;;  %s1067_s18 = smov 64  }
   0x5   :  { %v192_v10 = vsel %vm124_vm2, %v940_v4, %v187_v6  ;;  %v926_v15 = vld [vmem:[%s1734_s0 + $0x2fb] ss:$-190 sm:%s122_s27]   ;;  %v120_v19 = vsel %vm119_vm1, %v925_v12, %v116_v14  ;;  %v944_v21 = vld [vmem:[%s1734_s0 + $0x19] sm:$0x1]   ;;  %s155_s29 = smov 24  ;;  %s291_s30 = smov 24 }
   0x6   :  { %v196_v13 = vsel %vm128_vm3, %v941_v5, %v192_v10  ;;  %v927_v16 = vld [vmem:[%s1734_s0 + $0x3e] sm:$0x20]   ;;  %v945_v22 = vld [vmem:[%s1734_s0 + $0x58] sm:$0x2]   ;;  %v125_v24 = vsel %vm124_vm2, %v926_v15, %v120_v19  ;;  %v948_v28 = vld [vmem:[%s1734_s0 + $0x56] sm:$0x20]  }
   0x7   :  { %v928_v17 = vld [vmem:[%s1734_s0 + $0x7d] sm:$0x40]   ;;  %v200_v18 = vsel %vm132_vm4, %v942_v7, %v196_v13  ;;  %v217_v25 = vsel %vm115_vm0, %v945_v22, %v944_v21  ;;  %v946_v26 = vld [vmem:[%s1734_s0 + $0x97] sm:$0x4]   ;;  %v129_v29 = vsel %vm128_vm3, %v927_v16, %v125_v24  ;;  %v949_v31 = vld [vmem:[%s1734_s0 + $0x95] sm:$0x40]  }
   0x8   :  { %v929_v20 = vld [vmem:[%s1734_s0 + $0xbc] sm:$0x80]   ;;  %v204_v23 = vsel %vm136_vm5, %v943_v8, %v200_v18  ;;  %v947_v27 = vld [vmem:[%s1734_s0 + $0x313] ss:$-190 sm:%s223_s28]   ;;  %v221_v30 = vsel %vm119_vm1, %v946_v26, %v217_v25  ;;  %v930_v33 = vld [vmem:[%s1734_s0 + $0x9] sm:$0x1]   ;;  %v133_v34 = vsel %vm132_vm4, %v928_v17, %v129_v29 }
   0x9   :  { %205 = vrot.lane.b32.xlu1 %v204_v23, %s1067_s18  ;;  %v950_v32 = vld [vmem:[%s1734_s0 + $0xd4] sm:$0x80]   ;;  %v226_v35 = vsel %vm124_vm2, %v947_v27, %v221_v30  ;;  %v931_v36 = vld [vmem:[%s1734_s0 + $0x48] sm:$0x2]   ;;  %v137_v38 = vsel %vm136_vm5, %v929_v20, %v133_v34  ;;  %v934_v42 = vld [vmem:[%s1734_s0 + $0x46] sm:$0x20]  }
   0xa   :  { %v932_v37 = vld [vmem:[%s1734_s0 + $0x87] sm:$0x4]   ;;  %v230_v39 = vsel %vm128_vm3, %v948_v28, %v226_v35  ;;  %v149_v40 = vsel %vm115_vm0, %v931_v36, %v930_v33  ;;  %v935_v43 = vld [vmem:[%s1734_s0 + $0x85] sm:$0x40]   ;;  %138 = vrot.lane.b32.xlu0 %v137_v38, %s1067_s18  ;;  %v951_v59 = vld [vmem:[%s1734_s0 + $0x21] sm:$0x1]  }
   0xb   :  { %v933_v41 = vld [vmem:[%s1734_s0 + $0x303] ss:$-190 sm:%s155_s29]   ;;  %v234_v44 = vsel %vm132_vm4, %v949_v31, %v230_v39  ;;  %v153_v45 = vsel %vm119_vm1, %v932_v37, %v149_v40  ;;  %v952_v62 = vld [vmem:[%s1734_s0 + $0x60] sm:$0x2]   ;;  %s257_s2 = smov 24  ;;  %s359_s3 = smov 24 }
   0xc   :  { %v936_v46 = vld [vmem:[%s1734_s0 + $0xc4] sm:$0x80]   ;;  %v958_v47 = vld [vmem:[%s1734_s0 + $0x29] sm:$0x1]   ;;  %v238_v49 = vsel %vm136_vm5, %v950_v32, %v234_v44  ;;  %v158_v50 = vsel %vm124_vm2, %v933_v41, %v153_v45  ;;  %v953_v63 = vld [vmem:[%s1734_s0 + $0x9f] sm:$0x4]   ;;  %v251_v2 = vsel %vm115_vm0, %v952_v62, %v951_v59 }
   0xd   :  { %v959_v48 = vld [vmem:[%s1734_s0 + $0x68] sm:$0x2]   ;;  %v962_v54 = vld [vmem:[%s1734_s0 + $0x66] sm:$0x20]   ;;  %239 = vrot.lane.b32.xlu1 %v238_v49, %s1067_s18  ;;  %v162_v55 = vsel %vm128_vm3, %v934_v42, %v158_v50  ;;  %v955_v4 = vld [vmem:[%s1734_s0 + $0x5e] sm:$0x20]   ;;  %v255_v7 = vsel %vm119_vm1, %v953_v63, %v251_v2 }
   0xe   :  { %v285_v51 = vsel %vm115_vm0, %v959_v48, %v958_v47  ;;  %v960_v52 = vld [vmem:[%s1734_s0 + $0xa7] sm:$0x4]   ;;  %v963_v57 = vld [vmem:[%s1734_s0 + $0xa5] sm:$0x40]   ;;  %v166_v60 = vsel %vm132_vm4, %v935_v43, %v162_v55  ;;  %v956_v5 = vld [vmem:[%s1734_s0 + $0x9d] sm:$0x40]  }
   0xf   :  { %v961_v53 = vld [vmem:[%s1734_s0 + $0x323] ss:$-190 sm:%s291_s30]   ;;  %v289_v56 = vsel %vm119_vm1, %v960_v52, %v285_v51  ;;  %v170_v0 = vsel %vm136_vm5, %v936_v46, %v166_v60  ;;  %v972_v9 = vld [vmem:[%s1734_s0 + $0x39] sm:$0x1]   ;;  %v976_v16 = vld [vmem:[%s1734_s0 + $0x76] sm:$0x20]  }
  0x10   :  { %v964_v58 = vld [vmem:[%s1734_s0 + $0xe4] sm:$0x80]   ;;  %v294_v61 = vsel %vm124_vm2, %v961_v53, %v289_v56  ;;  %v954_v3 = vld [vmem:[%s1734_s0 + $0x31b] ss:$-190 sm:%s257_s2]   ;;  %171 = vrot.lane.b32.xlu0 %v170_v0, %s1067_s18  ;;  %s325_s4 = smov 24  ;;  %s427_s5 = smov 24 }
  0x11   :  { %v298_v1 = vsel %vm128_vm3, %v962_v54, %v294_v61  ;;  %v957_v8 = vld [vmem:[%s1734_s0 + $0xdc] sm:$0x80]   ;;  %v973_v10 = vld [vmem:[%s1734_s0 + $0x78] sm:$0x2]   ;;  %v260_v12 = vsel %vm124_vm2, %v954_v3, %v255_v7  ;;  %v977_v19 = vld [vmem:[%s1734_s0 + $0xb5] sm:$0x40]  }
  0x12   :  { %v302_v6 = vsel %vm132_vm4, %v963_v57, %v298_v1  ;;  %v353_v13 = vsel %vm115_vm0, %v973_v10, %v972_v9  ;;  %v974_v14 = vld [vmem:[%s1734_s0 + $0xb7] sm:$0x4]   ;;  %v264_v17 = vsel %vm128_vm3, %v955_v4, %v260_v12  ;;  %v978_v20 = vld [vmem:[%s1734_s0 + $0xf4] sm:$0x80]   ;;  %v965_v21 = vld [vmem:[%s1734_s0 + $0x31] sm:$0x1]  }
  0x13   :  { %v306_v11 = vsel %vm136_vm5, %v964_v58, %v302_v6  ;;  %v975_v15 = vld [vmem:[%s1734_s0 + $0x333] ss:$-190 sm:%s359_s3]   ;;  %v357_v18 = vsel %vm119_vm1, %v974_v14, %v353_v13  ;;  %v268_v22 = vsel %vm132_vm4, %v956_v5, %v264_v17  ;;  %v966_v24 = vld [vmem:[%s1734_s0 + $0x70] sm:$0x2]   ;;  %v986_v35 = vld [vmem:[%s1734_s0 + $0xd] sm:$0x1]  }
  0x14   :  { %307 = vrot.lane.b32.xlu1 %v306_v11, %s1067_s18  ;;  %v362_v23 = vsel %vm124_vm2, %v975_v15, %v357_v18  ;;  %v967_v25 = vld [vmem:[%s1734_s0 + $0xaf] sm:$0x4]   ;;  %v272_v26 = vsel %vm136_vm5, %v957_v8, %v268_v22  ;;  %v319_v28 = vsel %vm115_vm0, %v966_v24, %v965_v21  ;;  %v969_v30 = vld [vmem:[%s1734_s0 + $0x6e] sm:$0x20]   ;;  %v987_v36 = vld [vmem:[%s1734_s0 + $0x4c] sm:$0x2]  }
  0x15   :  { %v366_v27 = vsel %vm128_vm3, %v976_v16, %v362_v23  ;;  %v968_v29 = vld [vmem:[%s1734_s0 + $0x32b] ss:$-190 sm:%s325_s4]   ;;  %273 = vrot.lane.b32.xlu0 %v272_v26, %s1067_s18  ;;  %v323_v33 = vsel %vm119_vm1, %v967_v25, %v319_v28  ;;  %v421_v39 = vsel %vm115_vm0, %v987_v36, %v986_v35  ;;  %v979_v47 = vld [vmem:[%s1734_s0 + $0x5] sm:$0x1]   ;;  %s393_s6 = smov 24  ;;  %s495_s7 = smov 24 }
  0x16   :  { %v970_v31 = vld [vmem:[%s1734_s0 + $0xad] sm:$0x40]   ;;  %v370_v32 = vsel %vm132_vm4, %v977_v19, %v366_v27  ;;  %v328_v38 = vsel %vm124_vm2, %v968_v29, %v323_v33  ;;  %v988_v40 = vld [vmem:[%s1734_s0 + $0x8b] sm:$0x4]   ;;  %v990_v42 = vld [vmem:[%s1734_s0 + $0x4a] sm:$0x20]  }
  0x17   :  { %v971_v34 = vld [vmem:[%s1734_s0 + $0xec] sm:$0x80]   ;;  %v374_v37 = vsel %vm136_vm5, %v978_v20, %v370_v32  ;;  %v332_v43 = vsel %vm128_vm3, %v969_v30, %v328_v38  ;;  %v425_v44 = vsel %vm119_vm1, %v988_v40, %v421_v39  ;;  %v991_v45 = vld [vmem:[%s1734_s0 + $0x89] sm:$0x40]   ;;  %v980_v50 = vld [vmem:[%s1734_s0 + $0x44] sm:$0x2]  }
  0x18   :  { %v989_v41 = vld [vmem:[%s1734_s0 + $0x307] ss:$-190 sm:%s427_s5]   ;;  %375 = vrot.lane.b32.xlu1 %v374_v37, %s1067_s18  ;;  %v336_v48 = vsel %vm132_vm4, %v970_v31, %v332_v43  ;;  %v981_v51 = vld [vmem:[%s1734_s0 + $0x83] sm:$0x4]   ;;  %v387_v54 = vsel %vm115_vm0, %v980_v50, %v979_v47  ;;  %s461_s8 = smov 24  ;;  %s563_s9 = smov 24 }
  0x19   :  { %v992_v46 = vld [vmem:[%s1734_s0 + $0xc8] sm:$0x80]   ;;  %v430_v49 = vsel %vm124_vm2, %v989_v41, %v425_v44  ;;  %v340_v52 = vsel %vm136_vm5, %v971_v34, %v336_v48  ;;  %v982_v55 = vld [vmem:[%s1734_s0 + $0x2ff] ss:$-190 sm:%s393_s6]   ;;  %v391_v59 = vsel %vm119_vm1, %v981_v51, %v387_v54  ;;  %v1000_v61 = vld [vmem:[%s1734_s0 + $0x1d] sm:$0x1]  }
  0x1a   :  { %v434_v53 = vsel %vm128_vm3, %v990_v42, %v430_v49  ;;  %v983_v56 = vld [vmem:[%s1734_s0 + $0x42] sm:$0x20]   ;;  %341 = vrot.lane.b32.xlu0 %v340_v52, %s1067_s18  ;;  %v1001_v62 = vld [vmem:[%s1734_s0 + $0x5c] sm:$0x2]   ;;  %v396_v0 = vsel %vm124_vm2, %v982_v55, %v391_v59  ;;  %v1004_v4 = vld [vmem:[%s1734_s0 + $0x5a] sm:$0x20]  }
  0x1b   :  { %v984_v57 = vld [vmem:[%s1734_s0 + $0x81] sm:$0x40]   ;;  %v438_v58 = vsel %vm132_vm4, %v991_v45, %v434_v53  ;;  %v489_v1 = vsel %vm115_vm0, %v1001_v62, %v1000_v61  ;;  %v1002_v2 = vld [vmem:[%s1734_s0 + $0x9b] sm:$0x4]   ;;  %v400_v5 = vsel %vm128_vm3, %v983_v56, %v396_v0  ;;  %v1005_v7 = vld [vmem:[%s1734_s0 + $0x99] sm:$0x40]  }
  0x1c   :  { %v985_v60 = vld [vmem:[%s1734_s0 + $0xc0] sm:$0x80]   ;;  %v442_v63 = vsel %vm136_vm5, %v992_v46, %v438_v58  ;;  %v1003_v3 = vld [vmem:[%s1734_s0 + $0x317] ss:$-190 sm:%s495_s7]   ;;  %v493_v6 = vsel %vm119_vm1, %v1002_v2, %v489_v1  ;;  %v993_v9 = vld [vmem:[%s1734_s0 + $0x15] sm:$0x1]   ;;  %v404_v10 = vsel %vm132_vm4, %v984_v57, %v400_v5 }
  0x1d   :  { %443 = vrot.lane.b32.xlu1 %v442_v63, %s1067_s18  ;;  %v1006_v8 = vld [vmem:[%s1734_s0 + $0xd8] sm:$0x80]   ;;  %v498_v11 = vsel %vm124_vm2, %v1003_v3, %v493_v6  ;;  %v994_v12 = vld [vmem:[%s1734_s0 + $0x54] sm:$0x2]   ;;  %v408_v14 = vsel %vm136_vm5, %v985_v60, %v404_v10  ;;  %v997_v18 = vld [vmem:[%s1734_s0 + $0x52] sm:$0x20]  }
  0x1e   :  { %v995_v13 = vld [vmem:[%s1734_s0 + $0x93] sm:$0x4]   ;;  %v502_v15 = vsel %vm128_vm3, %v1004_v4, %v498_v11  ;;  %v455_v16 = vsel %vm115_vm0, %v994_v12, %v993_v9  ;;  %v998_v19 = vld [vmem:[%s1734_s0 + $0x91] sm:$0x40]   ;;  %409 = vrot.lane.b32.xlu0 %v408_v14, %s1067_s18  ;;  %v1014_v23 = vld [vmem:[%s1734_s0 + $0x2d] sm:$0x1]  }
  0x1f   :  { %v996_v17 = vld [vmem:[%s1734_s0 + $0x30f] ss:$-190 sm:%s461_s8]   ;;  %v506_v20 = vsel %vm132_vm4, %v1005_v7, %v502_v15  ;;  %v459_v21 = vsel %vm119_vm1, %v995_v13, %v455_v16  ;;  %v1015_v24 = vld [vmem:[%s1734_s0 + $0x6c] sm:$0x2]   ;;  %v1007_v35 = vld [vmem:[%s1734_s0 + $0x25] sm:$0x1]  }
  0x20   :  { %v999_v22 = vld [vmem:[%s1734_s0 + $0xd0] sm:$0x80]   ;;  %v510_v25 = vsel %vm136_vm5, %v1006_v8, %v506_v20  ;;  %v464_v26 = vsel %vm124_vm2, %v996_v17, %v459_v21  ;;  %v557_v27 = vsel %vm115_vm0, %v1015_v24, %v1014_v23  ;;  %v1016_v28 = vld [vmem:[%s1734_s0 + $0xab] sm:$0x4]   ;;  %v1018_v30 = vld [vmem:[%s1734_s0 + $0x6a] sm:$0x20]  }
  0x21   :  { %v1017_v29 = vld [vmem:[%s1734_s0 + $0x327] ss:$-190 sm:%s563_s9]   ;;  %511 = vrot.lane.b32.xlu1 %v510_v25, %s1067_s18  ;;  %v468_v31 = vsel %vm128_vm3, %v997_v18, %v464_v26  ;;  %v561_v32 = vsel %vm119_vm1, %v1016_v28, %v557_v27  ;;  %v1008_v38 = vld [vmem:[%s1734_s0 + $0x64] sm:$0x2]   ;;  %s529_s10 = smov 24  ;;  %s631_s11 = smov 24 }
  0x22   :  { %v1019_v33 = vld [vmem:[%s1734_s0 + $0xa9] sm:$0x40]   ;;  %v472_v36 = vsel %vm132_vm4, %v998_v19, %v468_v31  ;;  %v566_v37 = vsel %vm124_vm2, %v1017_v29, %v561_v32  ;;  %v1009_v39 = vld [vmem:[%s1734_s0 + $0xa3] sm:$0x4]   ;;  %v523_v42 = vsel %vm115_vm0, %v1008_v38, %v1007_v35  ;;  %v1011_v44 = vld [vmem:[%s1734_s0 + $0x62] sm:$0x20]  }
  0x23   :  { %v1020_v34 = vld [vmem:[%s1734_s0 + $0xe8] sm:$0x80]   ;;  %v476_v40 = vsel %vm136_vm5, %v999_v22, %v472_v36  ;;  %v570_v41 = vsel %vm128_vm3, %v1018_v30, %v566_v37  ;;  %v1010_v43 = vld [vmem:[%s1734_s0 + $0x31f] ss:$-190 sm:%s529_s10]   ;;  %v527_v47 = vsel %vm119_vm1, %v1009_v39, %v523_v42  ;;  %v1028_v49 = vld [vmem:[%s1734_s0 + $0x3d] sm:$0x1]  }
  0x24   :  { %v1012_v45 = vld [vmem:[%s1734_s0 + $0xa1] sm:$0x40]   ;;  %477 = vrot.lane.b32.xlu0 %v476_v40, %s1067_s18  ;;  %v574_v46 = vsel %vm132_vm4, %v1019_v33, %v570_v41  ;;  %v1029_v50 = vld [vmem:[%s1734_s0 + $0x7c] sm:$0x2]   ;;  %v532_v52 = vsel %vm124_vm2, %v1010_v43, %v527_v47  ;;  %v1032_v56 = vld [vmem:[%s1734_s0 + $0x7a] sm:$0x20]  }
  0x25   :  { %v1013_v48 = vld [vmem:[%s1734_s0 + $0xe0] sm:$0x80]   ;;  %v578_v51 = vsel %vm136_vm5, %v1020_v34, %v574_v46  ;;  %v625_v53 = vsel %vm115_vm0, %v1029_v50, %v1028_v49  ;;  %v1030_v54 = vld [vmem:[%s1734_s0 + $0xbb] sm:$0x4]   ;;  %v536_v57 = vsel %vm128_vm3, %v1011_v44, %v532_v52  ;;  %v1033_v59 = vld [vmem:[%s1734_s0 + $0xb9] sm:$0x40]  }
  0x26   :  { %v1031_v55 = vld [vmem:[%s1734_s0 + $0x337] ss:$-190 sm:%s631_s11]   ;;  %579 = vrot.lane.b32.xlu1 %v578_v51, %s1067_s18  ;;  %v629_v58 = vsel %vm119_vm1, %v1030_v54, %v625_v53  ;;  %v1021_v61 = vld [vmem:[%s1734_s0 + $0x35] sm:$0x1]   ;;  %v540_v62 = vsel %vm132_vm4, %v1012_v45, %v536_v57  ;;  %s597_s12 = smov 24  ;;  %vm3_vm6 = vcmask 523264  }
  0x27   :  { %v1034_v60 = vld [vmem:[%s1734_s0 + $0xf8] sm:$0x80]   ;;  %v634_v63 = vsel %vm124_vm2, %v1031_v55, %v629_v58  ;;  %v1022_v0 = vld [vmem:[%s1734_s0 + $0x74] sm:$0x2]   ;;  %v544_v2 = vsel %vm136_vm5, %v1013_v48, %v540_v62  ;;  %v1025_v6 = vld [vmem:[%s1734_s0 + $0x72] sm:$0x20]  }
  0x28   :  { %v1023_v1 = vld [vmem:[%s1734_s0 + $0xb3] sm:$0x4]   ;;  %v638_v3 = vsel %vm128_vm3, %v1032_v56, %v634_v63  ;;  %v591_v4 = vsel %vm115_vm0, %v1022_v0, %v1021_v61  ;;  %v1026_v7 = vld [vmem:[%s1734_s0 + $0xb1] sm:$0x40]   ;;  %545 = vrot.lane.b32.xlu0 %v544_v2, %s1067_s18  ;;  %v908_v11 = vld [vmem:[%s1734_s0 + $0x10] ss:$2 sm:$0xff]  }
  0x29   :  { %v1024_v5 = vld [vmem:[%s1734_s0 + $0x32f] ss:$-190 sm:%s597_s12]   ;;  %v642_v8 = vsel %vm132_vm4, %v1033_v59, %v638_v3  ;;  %v595_v9 = vsel %vm119_vm1, %v1023_v1, %v591_v4  ;;  %10 = vst.msk [vmem:[#allocation0 + $0x40] ss:$8 sm:$0xf] %vm3_vm6, %v908_v11   ;;  %vm140_vm7 = vcmask 1048064  }
  0x2a   :  { %v1027_v10 = vld [vmem:[%s1734_s0 + $0xf0] sm:$0x80]   ;;  %v646_v12 = vsel %vm136_vm5, %v1034_v60, %v642_v8  ;;  %v600_v13 = vsel %vm124_vm2, %v1024_v5, %v595_v9  ;;  %v912_v14 = vld [vmem:[%s1734_s0 + $0x50] ss:$2 sm:$0xff]   ;;  %v2_v18 = vld [vmem:[%s1734_s0] ss:$2 sm:$0xff]  }
  0x2b   :  { %v916_v15 = vld [vmem:[%s1734_s0 + $0x90] ss:$2 sm:$0xff]   ;;  %12 = vst.msk [vmem:[#allocation0 + $0x40] ss:$8 sm:$0xf0] %vm3_vm6, %v908_v11   ;;  %647 = vrot.lane.b32.xlu1 %v646_v12, %s1067_s18  ;;  %v604_v17 = vsel %vm128_vm3, %v1025_v6, %v600_v13 }
  0x2c   :  { %v920_v16 = vld [vmem:[%s1734_s0 + $0xd0] ss:$2 sm:$0xff]   ;;  %38 = vst.msk [vmem:[#allocation0 + $0x41] ss:$8 sm:$0xf] %vm3_vm6, %v912_v14   ;;  %v608_v21 = vsel %vm132_vm4, %v1026_v7, %v604_v17 }
  0x2d   :  { %66 = vst.msk [vmem:[#allocation0 + $0x42] ss:$8 sm:$0xf] %vm3_vm6, %v916_v15   ;;  %94 = vst.msk [vmem:[#allocation0 + $0x43] ss:$8 sm:$0xf] %vm3_vm6, %v920_v16   ;;  %v612_v25 = vsel %vm136_vm5, %v1027_v10, %v608_v21 }
  0x2e   :  { %40 = vst.msk [vmem:[#allocation0 + $0x41] ss:$8 sm:$0xf0] %vm3_vm6, %v912_v14   ;;  %68 = vst.msk [vmem:[#allocation0 + $0x42] ss:$8 sm:$0xf0] %vm3_vm6, %v916_v15   ;;  %613 = vrot.lane.b32.xlu0 %v612_v25, %s1067_s18 }
  0x2f   :  { %96 = vst.msk [vmem:[#allocation0 + $0x43] ss:$8 sm:$0xf0] %vm3_vm6, %v920_v16   ;;  %v911_v19 = vld [vmem:[%s1734_s0 + $0x40] ss:$2 sm:$0xff]  }
  0x30   :  { %v915_v20 = vld [vmem:[%s1734_s0 + $0x80] ss:$2 sm:$0xff]   ;;  %4 = vst.msk [vmem:[#allocation0] ss:$8 sm:$0xf] %vm3_vm6, %v2_v18  }
  0x31   :  { %31 = vst.msk [vmem:[#allocation0 + $0x1] ss:$8 sm:$0xf] %vm3_vm6, %v911_v19   ;;  %59 = vst.msk [vmem:[#allocation0 + $0x2] ss:$8 sm:$0xf] %vm3_vm6, %v915_v20  }
  0x32   :  { %v919_v22 = vld [vmem:[%s1734_s0 + $0xc0] ss:$2 sm:$0xff]   ;;  %5 = vst.msk [vmem:[#allocation0] ss:$8 sm:$0xf0] %vm3_vm6, %v2_v18  }
  0x33   :  { %33 = vst.msk [vmem:[#allocation0 + $0x1] ss:$8 sm:$0xf0] %vm3_vm6, %v911_v19   ;;  %61 = vst.msk [vmem:[#allocation0 + $0x2] ss:$8 sm:$0xf0] %vm3_vm6, %v915_v20  }
  0x34   :  { %v909_v23 = vld [vmem:[%s1734_s0 + $0x20] ss:$2 sm:$0xff]   ;;  %87 = vst.msk [vmem:[#allocation0 + $0x3] ss:$8 sm:$0xf] %vm3_vm6, %v919_v22  }
  0x35   :  { %v913_v24 = vld [vmem:[%s1734_s0 + $0x60] ss:$2 sm:$0xff]   ;;  %89 = vst.msk [vmem:[#allocation0 + $0x3] ss:$8 sm:$0xf0] %vm3_vm6, %v919_v22  }
  0x36   :  { %19 = vst.msk [vmem:[#allocation0 + $0x80] ss:$8 sm:$0xf0] %vm3_vm6, %v909_v23   ;;  %47 = vst.msk [vmem:[#allocation0 + $0x81] ss:$8 sm:$0xf0] %vm3_vm6, %v913_v24  }
  0x37   :  { %v917_v26 = vld [vmem:[%s1734_s0 + $0xa0] ss:$2 sm:$0xff]   ;;  %17 = vst.msk [vmem:[#allocation0 + $0x80] ss:$8 sm:$0xf] %vm3_vm6, %v909_v23  }
  0x38   :  { %v921_v27 = vld [vmem:[%s1734_s0 + $0xe0] ss:$2 sm:$0xff]   ;;  %45 = vst.msk [vmem:[#allocation0 + $0x81] ss:$8 sm:$0xf] %vm3_vm6, %v913_v24  }
  0x39   :  { %v910_v28 = vld [vmem:[%s1734_s0 + $0x30] ss:$2 sm:$0xff]   ;;  %75 = vst.msk [vmem:[#allocation0 + $0x82] ss:$8 sm:$0xf0] %vm3_vm6, %v917_v26  }
  0x3a   :  { %103 = vst.msk [vmem:[#allocation0 + $0x83] ss:$8 sm:$0xf0] %vm3_vm6, %v921_v27   ;;  %73 = vst.msk [vmem:[#allocation0 + $0x82] ss:$8 sm:$0xf] %vm3_vm6, %v917_v26  }
  0x3b   :  { %101 = vst.msk [vmem:[#allocation0 + $0x83] ss:$8 sm:$0xf] %vm3_vm6, %v921_v27   ;;  %26 = vst.msk [vmem:[#allocation0 + $0xc0] ss:$8 sm:$0xf0] %vm3_vm6, %v910_v28  }
  0x3c   :  { %v914_v29 = vld [vmem:[%s1734_s0 + $0x70] ss:$2 sm:$0xff]   ;;  %24 = vst.msk [vmem:[#allocation0 + $0xc0] ss:$8 sm:$0xf] %vm3_vm6, %v910_v28  }
  0x3d   :  { %v918_v30 = vld [vmem:[%s1734_s0 + $0xb0] ss:$2 sm:$0xff]   ;;  %54 = vst.msk [vmem:[#allocation0 + $0xc1] ss:$8 sm:$0xf0] %vm3_vm6, %v914_v29  }
  0x3e   :  { %v922_v31 = vld [vmem:[%s1734_s0 + $0xf0] ss:$2 sm:$0xff]   ;;  %82 = vst.msk [vmem:[#allocation0 + $0xc2] ss:$8 sm:$0xf0] %vm3_vm6, %v918_v30  }
  0x3f   :  { %110 = vst.msk [vmem:[#allocation0 + $0xc3] ss:$8 sm:$0xf0] %vm3_vm6, %v922_v31   ;;  %52 = vst.msk [vmem:[#allocation0 + $0xc1] ss:$8 sm:$0xf] %vm3_vm6, %v914_v29  }
  0x40   :  { %80 = vst.msk [vmem:[#allocation0 + $0xc2] ss:$8 sm:$0xf] %vm3_vm6, %v918_v30   ;;  %108 = vst.msk [vmem:[#allocation0 + $0xc3] ss:$8 sm:$0xf] %vm3_vm6, %v922_v31  }
  0x7b   :  { %v206_v32 = vpop.permute.xlu1 %205  }
  0x7c   :  { %209 = vst.msk [vmem:[#allocation0 + $0x40] sm:$0xf] %vm140_vm7, %v206_v32   ;;  %211 = vst.msk [vmem:[#allocation0 + $0x44] sm:$0xf0] %vm140_vm7, %v206_v32   ;;  %v139_v33 = vpop.permute.xlu0 %138  }
  0x7d   :  { %141 = vst.msk [vmem:[#allocation0] sm:$0xf] %vm140_vm7, %v139_v33   ;;  %143 = vst.msk [vmem:[#allocation0 + $0x4] sm:$0xf0] %vm140_vm7, %v139_v33  }
  0x7f   :  { %v240_v34 = vpop.permute.xlu1 %239  }
  0x80   :  { %243 = vst.msk [vmem:[#allocation0 + $0x60] sm:$0xf] %vm140_vm7, %v240_v34   ;;  %245 = vst.msk [vmem:[#allocation0 + $0x64] sm:$0xf0] %vm140_vm7, %v240_v34  }
  0x82   :  { %v172_v37 = vpop.permute.xlu0 %171  }
  0x83   :  { %v711_v35 = vld [vmem:[#allocation0 + $0x40] sm:$0xf]  ;;  %v718_v36 = vld [vmem:[#allocation0 + $0x48] sm:$0xf]  ;;  %175 = vst.msk [vmem:[#allocation0 + $0x20] sm:$0xf] %vm140_vm7, %v172_v37  }
  0x84   :  { %1042 = vst [vmem:[%s1735_s1 + $0x20] sm:$0xf] %v711_v35  ;;  %1043 = vst [vmem:[%s1735_s1 + $0x24] sm:$0xf] %v718_v36  ;;  %v658_v39 = vld [vmem:[#allocation0] sm:$0xf] }
  0x85   :  { %177 = vst.msk [vmem:[#allocation0 + $0x24] sm:$0xf0] %vm140_vm7, %v172_v37   ;;  %v663_v40 = vld [vmem:[#allocation0 + $0x8] sm:$0xf]  ;;  %661 = vst [vmem:[%s1735_s1] sm:$0xf] %v658_v39 }
  0x86   :  { %v308_v38 = vpop.permute.xlu1 %307   ;;  %1035 = vst [vmem:[%s1735_s1 + $0x4] sm:$0xf] %v663_v40 }
  0x87   :  { %311 = vst.msk [vmem:[#allocation0 + $0xa0] sm:$0xf] %vm140_vm7, %v308_v38   ;;  %313 = vst.msk [vmem:[#allocation0 + $0xa4] sm:$0xf0] %vm140_vm7, %v308_v38   ;;  %v739_v41 = vld [vmem:[#allocation0 + $0x60] sm:$0xf]  ;;  %v274_v43 = vpop.permute.xlu0 %273  }
  0x88   :  { %v746_v42 = vld [vmem:[#allocation0 + $0x68] sm:$0xf]  ;;  %1046 = vst [vmem:[%s1735_s1 + $0x30] sm:$0xf] %v739_v41  ;;  %277 = vst.msk [vmem:[#allocation0 + $0x80] sm:$0xf] %vm140_vm7, %v274_v43  }
  0x89   :  { %1047 = vst [vmem:[%s1735_s1 + $0x34] sm:$0xf] %v746_v42  ;;  %279 = vst.msk [vmem:[#allocation0 + $0x84] sm:$0xf0] %vm140_vm7, %v274_v43  }
  0x8a   :  { %v376_v44 = vpop.permute.xlu1 %375   ;;  %v683_v45 = vld [vmem:[#allocation0 + $0x20] sm:$0xf] }
  0x8b   :  { %379 = vst.msk [vmem:[#allocation0 + $0xe0] sm:$0xf] %vm140_vm7, %v376_v44   ;;  %381 = vst.msk [vmem:[#allocation0 + $0xe4] sm:$0xf0] %vm140_vm7, %v376_v44  }
  0x8c   :  { %v690_v46 = vld [vmem:[#allocation0 + $0x28] sm:$0xf]  ;;  %1038 = vst [vmem:[%s1735_s1 + $0x10] sm:$0xf] %v683_v45  ;;  %v342_v49 = vpop.permute.xlu0 %341  }
  0x8d   :  { %1039 = vst [vmem:[%s1735_s1 + $0x14] sm:$0xf] %v690_v46  ;;  %345 = vst.msk [vmem:[#allocation0 + $0xc0] sm:$0xf] %vm140_vm7, %v342_v49  }
  0x8e   :  { %v795_v47 = vld [vmem:[#allocation0 + $0xa0] sm:$0xf]  ;;  %v802_v48 = vld [vmem:[#allocation0 + $0xa8] sm:$0xf]  ;;  %347 = vst.msk [vmem:[#allocation0 + $0xc4] sm:$0xf0] %vm140_vm7, %v342_v49  }
  0x8f   :  { %1054 = vst [vmem:[%s1735_s1 + $0x50] sm:$0xf] %v795_v47  ;;  %1055 = vst [vmem:[%s1735_s1 + $0x54] sm:$0xf] %v802_v48  ;;  %v444_v50 = vpop.permute.xlu1 %443   ;;  %v767_v51 = vld [vmem:[#allocation0 + $0x80] sm:$0xf] }
  0x90   :  { %v774_v52 = vld [vmem:[#allocation0 + $0x88] sm:$0xf]  ;;  %447 = vst.msk [vmem:[#allocation0 + $0x30] sm:$0xf] %vm140_vm7, %v444_v50   ;;  %449 = vst.msk [vmem:[#allocation0 + $0x34] sm:$0xf0] %vm140_vm7, %v444_v50   ;;  %v410_v55 = vpop.permute.xlu0 %409  }
  0x91   :  { %1050 = vst [vmem:[%s1735_s1 + $0x40] sm:$0xf] %v767_v51  ;;  %1051 = vst [vmem:[%s1735_s1 + $0x44] sm:$0xf] %v774_v52 }
  0x92   :  { %v851_v53 = vld [vmem:[#allocation0 + $0xe0] sm:$0xf]  ;;  %v858_v54 = vld [vmem:[#allocation0 + $0xe8] sm:$0xf]  ;;  %413 = vst.msk [vmem:[#allocation0 + $0x10] sm:$0xf] %vm140_vm7, %v410_v55  }
  0x93   :  { %1062 = vst [vmem:[%s1735_s1 + $0x70] sm:$0xf] %v851_v53  ;;  %1063 = vst [vmem:[%s1735_s1 + $0x74] sm:$0xf] %v858_v54  ;;  %v512_v56 = vpop.permute.xlu1 %511  }
  0x94   :  { %415 = vst.msk [vmem:[#allocation0 + $0x14] sm:$0xf0] %vm140_vm7, %v410_v55   ;;  %v823_v57 = vld [vmem:[#allocation0 + $0xc0] sm:$0xf]  ;;  %515 = vst.msk [vmem:[#allocation0 + $0x70] sm:$0xf] %vm140_vm7, %v512_v56  }
  0x95   :  { %v830_v58 = vld [vmem:[#allocation0 + $0xc8] sm:$0xf]  ;;  %517 = vst.msk [vmem:[#allocation0 + $0x74] sm:$0xf0] %vm140_vm7, %v512_v56   ;;  %1058 = vst [vmem:[%s1735_s1 + $0x60] sm:$0xf] %v823_v57 }
  0x96   :  { %1059 = vst [vmem:[%s1735_s1 + $0x64] sm:$0xf] %v830_v58  ;;  %v478_v61 = vpop.permute.xlu0 %477  }
  0x97   :  { %v697_v59 = vld [vmem:[#allocation0 + $0x30] sm:$0xf]  ;;  %v704_v60 = vld [vmem:[#allocation0 + $0x38] sm:$0xf]  ;;  %481 = vst.msk [vmem:[#allocation0 + $0x50] sm:$0xf] %vm140_vm7, %v478_v61  }
  0x98   :  { %1040 = vst [vmem:[%s1735_s1 + $0x18] sm:$0xf] %v697_v59  ;;  %1041 = vst [vmem:[%s1735_s1 + $0x1c] sm:$0xf] %v704_v60  ;;  %v580_v62 = vpop.permute.xlu1 %579  }
  0x99   :  { %483 = vst.msk [vmem:[#allocation0 + $0x54] sm:$0xf0] %vm140_vm7, %v478_v61   ;;  %v669_v63 = vld [vmem:[#allocation0 + $0x10] sm:$0xf]  ;;  %583 = vst.msk [vmem:[#allocation0 + $0xb0] sm:$0xf] %vm140_vm7, %v580_v62  }
  0x9a   :  { %585 = vst.msk [vmem:[#allocation0 + $0xb4] sm:$0xf0] %vm140_vm7, %v580_v62   ;;  %1036 = vst [vmem:[%s1735_s1 + $0x8] sm:$0xf] %v669_v63  ;;  %v546_v3 = vpop.permute.xlu0 %545  }
  0x9b   :  { %v676_v0 = vld [vmem:[#allocation0 + $0x18] sm:$0xf]  ;;  %v753_v1 = vld [vmem:[#allocation0 + $0x70] sm:$0xf]  ;;  %549 = vst.msk [vmem:[#allocation0 + $0x90] sm:$0xf] %vm140_vm7, %v546_v3  }
  0x9c   :  { %1037 = vst [vmem:[%s1735_s1 + $0xc] sm:$0xf] %v676_v0  ;;  %v760_v2 = vld [vmem:[#allocation0 + $0x78] sm:$0xf]  ;;  %1048 = vst [vmem:[%s1735_s1 + $0x38] sm:$0xf] %v753_v1 }
  0x9d   :  { %1049 = vst [vmem:[%s1735_s1 + $0x3c] sm:$0xf] %v760_v2  ;;  %551 = vst.msk [vmem:[#allocation0 + $0x94] sm:$0xf0] %vm140_vm7, %v546_v3   ;;  %v648_v4 = vpop.permute.xlu1 %647  }
  0x9e   :  { %v725_v5 = vld [vmem:[#allocation0 + $0x50] sm:$0xf]  ;;  %651 = vst.msk [vmem:[#allocation0 + $0xf0] sm:$0xf] %vm140_vm7, %v648_v4   ;;  %653 = vst.msk [vmem:[#allocation0 + $0xf4] sm:$0xf0] %vm140_vm7, %v648_v4  }
  0x9f   :  { %1044 = vst [vmem:[%s1735_s1 + $0x28] sm:$0xf] %v725_v5 }
  0xa0   :  { %v732_v6 = vld [vmem:[#allocation0 + $0x58] sm:$0xf]  ;;  %v809_v7 = vld [vmem:[#allocation0 + $0xb0] sm:$0xf]  ;;  %v614_v9 = vpop.permute.xlu0 %613  }
  0xa1   :  { %1045 = vst [vmem:[%s1735_s1 + $0x2c] sm:$0xf] %v732_v6  ;;  %v816_v8 = vld [vmem:[#allocation0 + $0xb8] sm:$0xf]  ;;  %1056 = vst [vmem:[%s1735_s1 + $0x58] sm:$0xf] %v809_v7 }
  0xa2   :  { %1057 = vst [vmem:[%s1735_s1 + $0x5c] sm:$0xf] %v816_v8  ;;  %617 = vst.msk [vmem:[#allocation0 + $0xd0] sm:$0xf] %vm140_vm7, %v614_v9   ;;  %v781_v10 = vld [vmem:[#allocation0 + $0x90] sm:$0xf] }
  0xa3   :  { %619 = vst.msk [vmem:[#allocation0 + $0xd4] sm:$0xf0] %vm140_vm7, %v614_v9   ;;  %1052 = vst [vmem:[%s1735_s1 + $0x48] sm:$0xf] %v781_v10 }
  0xa4   :  { %v788_v11 = vld [vmem:[#allocation0 + $0x98] sm:$0xf] }
  0xa5   :  { %1053 = vst [vmem:[%s1735_s1 + $0x4c] sm:$0xf] %v788_v11  ;;  %v865_v12 = vld [vmem:[#allocation0 + $0xf0] sm:$0xf]  ;;  %v872_v13 = vld [vmem:[#allocation0 + $0xf8] sm:$0xf] }
  0xa6   :  { %1064 = vst [vmem:[%s1735_s1 + $0x78] sm:$0xf] %v865_v12  ;;  %1065 = vst [vmem:[%s1735_s1 + $0x7c] sm:$0xf] %v872_v13 }
  0xa9   :  { %v837_v14 = vld [vmem:[#allocation0 + $0xd0] sm:$0xf] }
  0xaa   :  { %v844_v15 = vld [vmem:[#allocation0 + $0xd8] sm:$0xf]  ;;  %1060 = vst [vmem:[%s1735_s1 + $0x68] sm:$0xf] %v837_v14 }
  0xab   :  { %1061 = vst [vmem:[%s1735_s1 + $0x6c] sm:$0xf] %v844_v15 }

// kernel: forward.1
= control target key start
LH: loop header
LB: loop body
LE: loop exit
PB: predicated region body
PF: predicated region fallthrough
CT: control target
= control target key end

     0   :  { %9 = vsyncpa [#allocation5], 0  ;;  %s2348_s12 = smov [#allocation4]   ;;  %s2429_s0 = inlined_call_operand.vmem [shape: f32[4,4096], index: 0, kind: input, shape index: {}]   ;;  %s2430_s1 = inlined_call_operand.hbm [shape: f32[4096,128], index: 1, kind: input, shape index: {}]   ;;  %s2431_s2 = inlined_call_operand.<no memory space> [shape: f32[1], index: 2, kind: input, shape index: {}]   ;;  %s2432_s3 = inlined_call_operand.vmem [shape: f32[4,128], index: 3, kind: output, shape index: {}]  }
   0x1   :  { %s17_s13 = sshll.u32 %s2348_s12, 4  ;;  %s18_s13 = int_to_ptr.vmem [resolvable:$true] %s17_s13 }
   0x2   :  { %s2334_s14 = scalar_lea.vmem %s18_s13, 65536  ;;  %p2339_p1 = scmp.lt.s32.totalorder %s18_s13, %s18_s13 }
   0x3   :  { %p2335_p0 = scmp.ne.s32.totalorder %s18_s13, %s2334_s14  ;;  %p2340_p2 = scmp.lt.s32.totalorder %s2334_s14, %s2334_s14 }
   0x5   :  { %p2341_p3 = por %p2340_p2, %p2339_p1 }
   0x7   :  { %p2342_p4 = pnand %p2341_p3, %p2335_p0 }
   0x9   :  { %2345 = shalt.err (!%p2342_p4)
}
   0xa   :  { %s2349_s15 = smov 128   ;;  %s2350_s16 = smov 8  }
   0xb   :  { %23 = dma.hbm_to_vmem [thread:$0]  %s2430_s1, 65536, %s18_s13, [#allocation5], %s2349_s15, %s2349_s15, %s2350_s16  }
   0xc   :  { %2346 = dma.done.wait [#allocation5], 65536  }
   0xd   :  { %2347 = vsyncadd [#allocation5], 4294901760  ;;  %v82_v0 = vld [vmem:[#allocation4 + $0xf8] sm:$0xff]  ;;  %v81_v4 = vld [vmem:[#allocation4 + $0xf0] sm:$0xff] }
   0xe   :  { %v114_v1 = vld [vmem:[#allocation4 + $0x1f8] sm:$0xff]  ;;  %1746 = vmatprep.subr.mxu0 %v82_v0  ;;  %v113_v5 = vld [vmem:[#allocation4 + $0x1f0] sm:$0xff]  ;;  %v80_v8 = vld [vmem:[#allocation4 + $0xe8] sm:$0xff] }
   0xf   :  { %v66_v2 = vld [vmem:[#allocation4 + $0x78] sm:$0xff]  ;;  %1781 = vmatprep.subr.mxu1 %v114_v1  ;;  %v65_v6 = vld [vmem:[#allocation4 + $0x70] sm:$0xff]  ;;  %v112_v9 = vld [vmem:[#allocation4 + $0x1e8] sm:$0xff] }
  0x10   :  { %v98_v3 = vld [vmem:[#allocation4 + $0x178] sm:$0xff]  ;;  %1747 = vmatpush3.msra.mxu0 %v66_v2  ;;  %v97_v7 = vld [vmem:[#allocation4 + $0x170] sm:$0xff]  ;;  %v64_v10 = vld [vmem:[#allocation4 + $0x68] sm:$0xff] }
  0x11   :  { %1782 = vmatpush3.msra.mxu1 %v98_v3  ;;  %1748 = vmatprep.subr.mxu0 %v81_v4  ;;  %v96_v11 = vld [vmem:[#allocation4 + $0x168] sm:$0xff]  ;;  %v79_v12 = vld [vmem:[#allocation4 + $0xe0] sm:$0xff]  ;;  %v78_v16 = vld [vmem:[#allocation4 + $0xd8] sm:$0xff] }
  0x12   :  { %1783 = vmatprep.subr.mxu1 %v113_v5  ;;  %1749 = vmatpush3.msra.mxu0 %v65_v6  ;;  %v111_v13 = vld [vmem:[#allocation4 + $0x1e0] sm:$0xff]  ;;  %v110_v17 = vld [vmem:[#allocation4 + $0x1d8] sm:$0xff]  ;;  %v77_v20 = vld [vmem:[#allocation4 + $0xd0] sm:$0xff] }
  0x13   :  { %1784 = vmatpush3.msra.mxu1 %v97_v7  ;;  %1750 = vmatprep.subr.mxu0 %v80_v8  ;;  %v63_v14 = vld [vmem:[#allocation4 + $0x60] sm:$0xff]  ;;  %v62_v18 = vld [vmem:[#allocation4 + $0x58] sm:$0xff]  ;;  %v109_v21 = vld [vmem:[#allocation4 + $0x1d0] sm:$0xff] }
  0x14   :  { %1785 = vmatprep.subr.mxu1 %v112_v9  ;;  %v95_v15 = vld [vmem:[#allocation4 + $0x160] sm:$0xff]  ;;  %1751 = vmatpush3.msra.mxu0 %v64_v10  ;;  %v94_v19 = vld [vmem:[#allocation4 + $0x158] sm:$0xff]  ;;  %v61_v22 = vld [vmem:[#allocation4 + $0x50] sm:$0xff] }
  0x15   :  { %1786 = vmatpush3.msra.mxu1 %v96_v11  ;;  %1752 = vmatprep.subr.mxu0 %v79_v12  ;;  %v93_v23 = vld [vmem:[#allocation4 + $0x150] sm:$0xff]  ;;  %v76_v24 = vld [vmem:[#allocation4 + $0xc8] sm:$0xff]  ;;  %v75_v28 = vld [vmem:[#allocation4 + $0xc0] sm:$0xff] }
  0x16   :  { %1787 = vmatprep.subr.mxu1 %v111_v13  ;;  %1753 = vmatpush3.msra.mxu0 %v63_v14  ;;  %v108_v25 = vld [vmem:[#allocation4 + $0x1c8] sm:$0xff]  ;;  %v107_v29 = vld [vmem:[#allocation4 + $0x1c0] sm:$0xff]  ;;  %v74_v32 = vld [vmem:[#allocation4 + $0xb8] sm:$0xff] }
  0x17   :  { %1788 = vmatpush3.msra.mxu1 %v95_v15  ;;  %1754 = vmatprep.subr.mxu0 %v78_v16  ;;  %v60_v26 = vld [vmem:[#allocation4 + $0x48] sm:$0xff]  ;;  %v59_v30 = vld [vmem:[#allocation4 + $0x40] sm:$0xff]  ;;  %v106_v33 = vld [vmem:[#allocation4 + $0x1b8] sm:$0xff] }
  0x18   :  { %1789 = vmatprep.subr.mxu1 %v110_v17  ;;  %1755 = vmatpush3.msra.mxu0 %v62_v18  ;;  %v92_v27 = vld [vmem:[#allocation4 + $0x148] sm:$0xff]  ;;  %v91_v31 = vld [vmem:[#allocation4 + $0x140] sm:$0xff]  ;;  %v58_v34 = vld [vmem:[#allocation4 + $0x38] sm:$0xff] }
  0x19   :  { %1790 = vmatpush3.msra.mxu1 %v94_v19  ;;  %1756 = vmatprep.subr.mxu0 %v77_v20  ;;  %v90_v35 = vld [vmem:[#allocation4 + $0x138] sm:$0xff]  ;;  %v73_v36 = vld [vmem:[#allocation4 + $0xb0] sm:$0xff]  ;;  %v72_v40 = vld [vmem:[#allocation4 + $0xa8] sm:$0xff] }
  0x1a   :  { %1791 = vmatprep.subr.mxu1 %v109_v21  ;;  %1757 = vmatpush3.msra.mxu0 %v61_v22  ;;  %v105_v37 = vld [vmem:[#allocation4 + $0x1b0] sm:$0xff]  ;;  %v104_v41 = vld [vmem:[#allocation4 + $0x1a8] sm:$0xff]  ;;  %v71_v44 = vld [vmem:[#allocation4 + $0xa0] sm:$0xff] }
  0x1b   :  { %1792 = vmatpush3.msra.mxu1 %v93_v23  ;;  %1758 = vmatprep.subr.mxu0 %v76_v24  ;;  %v57_v38 = vld [vmem:[#allocation4 + $0x30] sm:$0xff]  ;;  %v56_v42 = vld [vmem:[#allocation4 + $0x28] sm:$0xff]  ;;  %v103_v45 = vld [vmem:[#allocation4 + $0x1a0] sm:$0xff] }
  0x1c   :  { %1793 = vmatprep.subr.mxu1 %v108_v25  ;;  %1759 = vmatpush3.msra.mxu0 %v60_v26  ;;  %v89_v39 = vld [vmem:[#allocation4 + $0x130] sm:$0xff]  ;;  %v88_v43 = vld [vmem:[#allocation4 + $0x128] sm:$0xff]  ;;  %v55_v46 = vld [vmem:[#allocation4 + $0x20] sm:$0xff] }
  0x1d   :  { %1794 = vmatpush3.msra.mxu1 %v92_v27  ;;  %1760 = vmatprep.subr.mxu0 %v75_v28  ;;  %v87_v47 = vld [vmem:[#allocation4 + $0x120] sm:$0xff]  ;;  %v70_v48 = vld [vmem:[#allocation4 + $0x98] sm:$0xff]  ;;  %v69_v52 = vld [vmem:[#allocation4 + $0x90] sm:$0xff] }
  0x1e   :  { %1795 = vmatprep.subr.mxu1 %v107_v29  ;;  %1761 = vmatpush3.msra.mxu0 %v59_v30  ;;  %v102_v49 = vld [vmem:[#allocation4 + $0x198] sm:$0xff]  ;;  %v101_v53 = vld [vmem:[#allocation4 + $0x190] sm:$0xff]  ;;  %v68_v57 = vld [vmem:[#allocation4 + $0x88] sm:$0xff] }
  0x1f   :  { %1796 = vmatpush3.msra.mxu1 %v91_v31  ;;  %1762 = vmatprep.subr.mxu0 %v74_v32  ;;  %v54_v50 = vld [vmem:[#allocation4 + $0x18] sm:$0xff]  ;;  %v53_v54 = vld [vmem:[#allocation4 + $0x10] sm:$0xff]  ;;  %v100_v58 = vld [vmem:[#allocation4 + $0x188] sm:$0xff] }
  0x20   :  { %1797 = vmatprep.subr.mxu1 %v106_v33  ;;  %1763 = vmatpush3.msra.mxu0 %v58_v34  ;;  %v86_v51 = vld [vmem:[#allocation4 + $0x118] sm:$0xff]  ;;  %v85_v55 = vld [vmem:[#allocation4 + $0x110] sm:$0xff]  ;;  %v36_v59 = vld [vmem:[%s2429_s0 + $0x8] sm:$0xff] }
  0x21   :  { %1798 = vmatpush3.msra.mxu1 %v90_v35  ;;  %1764 = vmatprep.subr.mxu0 %v73_v36  ;;  %v35_v56 = vld [vmem:[%s2429_s0] sm:$0xff]  ;;  %v52_v60 = vld [vmem:[#allocation4 + $0x8] sm:$0xff]  ;;  %v580_v2 = vcombine.high %v36_v59, %v36_v59  ;;  %v145_v8 = vld [vmem:[#allocation4 + $0x2f0] sm:$0xff] }
  0x22   :  { %1799 = vmatprep.subr.mxu1 %v105_v37  ;;  %1765 = vmatpush3.msra.mxu0 %v57_v38  ;;  %v84_v61 = vld [vmem:[#allocation4 + $0x108] sm:$0xff]  ;;  %v67_v62 = vld [vmem:[#allocation4 + $0x80] sm:$0xff]  ;;  %v579_v0 = vcombine.high %v35_v56, %v35_v56  ;;  %v146_v4 = vld [vmem:[#allocation4 + $0x2f8] sm:$0xff] }
  0x23   :  { %1800 = vmatpush3.msra.mxu1 %v89_v39  ;;  %1766 = vmatprep.subr.mxu0 %v72_v40  ;;  %v99_v63 = vld [vmem:[#allocation4 + $0x180] sm:$0xff]  ;;  %v178_v5 = vld [vmem:[#allocation4 + $0x3f8] sm:$0xff]  ;;  %v177_v9 = vld [vmem:[#allocation4 + $0x3f0] sm:$0xff] }
  0x24   :  { %1801 = vmatprep.subr.mxu1 %v104_v41  ;;  %1767 = vmatpush3.msra.mxu0 %v56_v42  ;;  %v51_v1 = vld [vmem:[#allocation4] sm:$0xff]  ;;  %v130_v6 = vld [vmem:[#allocation4 + $0x278] sm:$0xff]  ;;  %v129_v10 = vld [vmem:[#allocation4 + $0x270] sm:$0xff] }
  0x25   :  { %1802 = vmatpush3.msra.mxu1 %v88_v43  ;;  %1768 = vmatprep.subr.mxu0 %v71_v44  ;;  %v83_v3 = vld [vmem:[#allocation4 + $0x100] sm:$0xff]  ;;  %v162_v7 = vld [vmem:[#allocation4 + $0x378] sm:$0xff]  ;;  %v161_v11 = vld [vmem:[#allocation4 + $0x370] sm:$0xff] }
  0x26   :  { %1803 = vmatprep.subr.mxu1 %v103_v45  ;;  %1769 = vmatpush3.msra.mxu0 %v55_v46  ;;  %v144_v12 = vld [vmem:[#allocation4 + $0x2e8] sm:$0xff]  ;;  %v143_v16 = vld [vmem:[#allocation4 + $0x2e0] sm:$0xff]  ;;  %v142_v20 = vld [vmem:[#allocation4 + $0x2d8] sm:$0xff] }
  0x27   :  { %1804 = vmatpush3.msra.mxu1 %v87_v47  ;;  %1770 = vmatprep.subr.mxu0 %v70_v48  ;;  %v176_v13 = vld [vmem:[#allocation4 + $0x3e8] sm:$0xff]  ;;  %v175_v17 = vld [vmem:[#allocation4 + $0x3e0] sm:$0xff]  ;;  %v174_v21 = vld [vmem:[#allocation4 + $0x3d8] sm:$0xff] }
  0x28   :  { %1805 = vmatprep.subr.mxu1 %v102_v49  ;;  %1771 = vmatpush3.msra.mxu0 %v54_v50  ;;  %v128_v14 = vld [vmem:[#allocation4 + $0x268] sm:$0xff]  ;;  %v127_v18 = vld [vmem:[#allocation4 + $0x260] sm:$0xff]  ;;  %v126_v22 = vld [vmem:[#allocation4 + $0x258] sm:$0xff] }
  0x29   :  { %1806 = vmatpush3.msra.mxu1 %v86_v51  ;;  %1772 = vmatprep.subr.mxu0 %v69_v52  ;;  %v160_v15 = vld [vmem:[#allocation4 + $0x368] sm:$0xff]  ;;  %v159_v19 = vld [vmem:[#allocation4 + $0x360] sm:$0xff]  ;;  %v158_v23 = vld [vmem:[#allocation4 + $0x358] sm:$0xff] }
  0x2a   :  { %1807 = vmatprep.subr.mxu1 %v101_v53  ;;  %1773 = vmatpush3.msra.mxu0 %v53_v54  ;;  %v141_v24 = vld [vmem:[#allocation4 + $0x2d0] sm:$0xff]  ;;  %v140_v28 = vld [vmem:[#allocation4 + $0x2c8] sm:$0xff]  ;;  %v139_v32 = vld [vmem:[#allocation4 + $0x2c0] sm:$0xff] }
  0x2b   :  { %1808 = vmatpush3.msra.mxu1 %v85_v55  ;;  %1774 = vmatprep.subr.mxu0 %v68_v57  ;;  %v173_v25 = vld [vmem:[#allocation4 + $0x3d0] sm:$0xff]  ;;  %v172_v29 = vld [vmem:[#allocation4 + $0x3c8] sm:$0xff]  ;;  %v171_v33 = vld [vmem:[#allocation4 + $0x3c0] sm:$0xff] }
  0x2c   :  { %1809 = vmatprep.subr.mxu1 %v100_v58  ;;  %1775 = vmatpush3.msra.mxu0 %v52_v60  ;;  %v125_v26 = vld [vmem:[#allocation4 + $0x250] sm:$0xff]  ;;  %v124_v30 = vld [vmem:[#allocation4 + $0x248] sm:$0xff]  ;;  %v123_v34 = vld [vmem:[#allocation4 + $0x240] sm:$0xff] }
  0x2d   :  { %1810 = vmatpush3.msra.mxu1 %v84_v61  ;;  %1776 = vmatprep.subr.mxu0 %v67_v62  ;;  %v157_v27 = vld [vmem:[#allocation4 + $0x350] sm:$0xff]  ;;  %v156_v31 = vld [vmem:[#allocation4 + $0x348] sm:$0xff]  ;;  %v155_v35 = vld [vmem:[#allocation4 + $0x340] sm:$0xff] }
  0x2e   :  { %1811 = vmatprep.subr.mxu1 %v99_v63  ;;  %1777 = vmatpush3.msra.mxu0 %v51_v1  ;;  %v138_v36 = vld [vmem:[#allocation4 + $0x2b8] sm:$0xff]  ;;  %v137_v40 = vld [vmem:[#allocation4 + $0x2b0] sm:$0xff]  ;;  %v136_v44 = vld [vmem:[#allocation4 + $0x2a8] sm:$0xff] }
  0x2f   :  { %675 = vmatprep.mubr.f32.mxu0 %v579_v0  ;;  %1812 = vmatpush3.msra.mxu1 %v83_v3  ;;  %v170_v37 = vld [vmem:[#allocation4 + $0x3b8] sm:$0xff]  ;;  %v169_v41 = vld [vmem:[#allocation4 + $0x3b0] sm:$0xff]  ;;  %v168_v45 = vld [vmem:[#allocation4 + $0x3a8] sm:$0xff] }
  0x30   :  { %745 = vmatprep.mubr.f32.mxu1 %v580_v2  ;;  %676 = vmatmul.mubr.f32.vlgmr.msra.gmra.mxu0 %v35_v56  ;;  %v122_v38 = vld [vmem:[#allocation4 + $0x238] sm:$0xff]  ;;  %v121_v42 = vld [vmem:[#allocation4 + $0x230] sm:$0xff]  ;;  %v120_v46 = vld [vmem:[#allocation4 + $0x228] sm:$0xff] }
  0x31   :  { %746 = vmatmul.mubr.f32.vlgmr.msra.gmra.mxu1 %v36_v59  ;;  %1816 = vmatprep.subr.mxu0 %v146_v4  ;;  %v154_v39 = vld [vmem:[#allocation4 + $0x338] sm:$0xff]  ;;  %v153_v43 = vld [vmem:[#allocation4 + $0x330] sm:$0xff]  ;;  %v152_v47 = vld [vmem:[#allocation4 + $0x328] sm:$0xff] }
  0x32   :  { %1851 = vmatprep.subr.mxu1 %v178_v5  ;;  %1817 = vmatpush3.msra.mxu0 %v130_v6  ;;  %v135_v48 = vld [vmem:[#allocation4 + $0x2a0] sm:$0xff]  ;;  %v134_v52 = vld [vmem:[#allocation4 + $0x298] sm:$0xff]  ;;  %v133_v56 = vld [vmem:[#allocation4 + $0x290] sm:$0xff] }
  0x33   :  { %1852 = vmatpush3.msra.mxu1 %v162_v7  ;;  %1818 = vmatprep.subr.mxu0 %v145_v8  ;;  %v167_v49 = vld [vmem:[#allocation4 + $0x3a0] sm:$0xff]  ;;  %v166_v53 = vld [vmem:[#allocation4 + $0x398] sm:$0xff]  ;;  %v165_v57 = vld [vmem:[#allocation4 + $0x390] sm:$0xff] }
  0x34   :  { %1853 = vmatprep.subr.mxu1 %v177_v9  ;;  %1819 = vmatpush3.msra.mxu0 %v129_v10  ;;  %v119_v50 = vld [vmem:[#allocation4 + $0x220] sm:$0xff]  ;;  %v118_v54 = vld [vmem:[#allocation4 + $0x218] sm:$0xff]  ;;  %v117_v58 = vld [vmem:[#allocation4 + $0x210] sm:$0xff] }
  0x35   :  { %1854 = vmatpush3.msra.mxu1 %v161_v11  ;;  %1820 = vmatprep.subr.mxu0 %v144_v12  ;;  %v151_v51 = vld [vmem:[#allocation4 + $0x320] sm:$0xff]  ;;  %v150_v55 = vld [vmem:[#allocation4 + $0x318] sm:$0xff]  ;;  %v149_v59 = vld [vmem:[#allocation4 + $0x310] sm:$0xff] }
  0x36   :  { %1855 = vmatprep.subr.mxu1 %v176_v13  ;;  %1821 = vmatpush3.msra.mxu0 %v128_v14  ;;  %v37_v60 = vld [vmem:[%s2429_s0 + $0x10] sm:$0xff]  ;;  %v38_v1 = vld [vmem:[%s2429_s0 + $0x18] sm:$0xff]  ;;  %v131_v2 = vld [vmem:[#allocation4 + $0x280] sm:$0xff] }
  0x37   :  { %1856 = vmatpush3.msra.mxu1 %v160_v15  ;;  %1822 = vmatprep.subr.mxu0 %v143_v16  ;;  %v132_v61 = vld [vmem:[#allocation4 + $0x288] sm:$0xff]  ;;  %v163_v3 = vld [vmem:[#allocation4 + $0x380] sm:$0xff]  ;;  %v581_v4 = vcombine.high %v37_v60, %v37_v60  ;;  %v582_v7 = vcombine.high %v38_v1, %v38_v1  ;;  %v210_v8 = vld [vmem:[#allocation4 + $0x4f8] sm:$0xff] }
  0x38   :  { %1857 = vmatprep.subr.mxu1 %v175_v17  ;;  %1823 = vmatpush3.msra.mxu0 %v127_v18  ;;  %v164_v62 = vld [vmem:[#allocation4 + $0x388] sm:$0xff]  ;;  %v115_v5 = vld [vmem:[#allocation4 + $0x200] sm:$0xff]  ;;  %v242_v9 = vld [vmem:[#allocation4 + $0x5f8] sm:$0xff] }
  0x39   :  { %1858 = vmatpush3.msra.mxu1 %v159_v19  ;;  %1824 = vmatprep.subr.mxu0 %v142_v20  ;;  %v116_v63 = vld [vmem:[#allocation4 + $0x208] sm:$0xff]  ;;  %v147_v6 = vld [vmem:[#allocation4 + $0x300] sm:$0xff]  ;;  %v194_v10 = vld [vmem:[#allocation4 + $0x478] sm:$0xff] }
  0x3a   :  { %1859 = vmatprep.subr.mxu1 %v174_v21  ;;  %1825 = vmatpush3.msra.mxu0 %v126_v22  ;;  %v148_v0 = vld [vmem:[#allocation4 + $0x308] sm:$0xff]  ;;  %v226_v11 = vld [vmem:[#allocation4 + $0x578] sm:$0xff]  ;;  %v209_v12 = vld [vmem:[#allocation4 + $0x4f0] sm:$0xff] }
  0x3b   :  { %1860 = vmatpush3.msra.mxu1 %v158_v23  ;;  %1826 = vmatprep.subr.mxu0 %v141_v24  ;;  %v241_v13 = vld [vmem:[#allocation4 + $0x5f0] sm:$0xff]  ;;  %v208_v16 = vld [vmem:[#allocation4 + $0x4e8] sm:$0xff]  ;;  %v207_v20 = vld [vmem:[#allocation4 + $0x4e0] sm:$0xff] }
  0x3c   :  { %1861 = vmatprep.subr.mxu1 %v173_v25  ;;  %1827 = vmatpush3.msra.mxu0 %v125_v26  ;;  %v193_v14 = vld [vmem:[#allocation4 + $0x470] sm:$0xff]  ;;  %v240_v17 = vld [vmem:[#allocation4 + $0x5e8] sm:$0xff]  ;;  %v239_v21 = vld [vmem:[#allocation4 + $0x5e0] sm:$0xff] }
  0x3d   :  { %1862 = vmatpush3.msra.mxu1 %v157_v27  ;;  %1828 = vmatprep.subr.mxu0 %v140_v28  ;;  %v225_v15 = vld [vmem:[#allocation4 + $0x570] sm:$0xff]  ;;  %v192_v18 = vld [vmem:[#allocation4 + $0x468] sm:$0xff]  ;;  %v191_v22 = vld [vmem:[#allocation4 + $0x460] sm:$0xff] }
  0x3e   :  { %1863 = vmatprep.subr.mxu1 %v172_v29  ;;  %1829 = vmatpush3.msra.mxu0 %v124_v30  ;;  %v224_v19 = vld [vmem:[#allocation4 + $0x568] sm:$0xff]  ;;  %v223_v23 = vld [vmem:[#allocation4 + $0x560] sm:$0xff]  ;;  %v206_v24 = vld [vmem:[#allocation4 + $0x4d8] sm:$0xff] }
  0x3f   :  { %1864 = vmatpush3.msra.mxu1 %v156_v31  ;;  %1830 = vmatprep.subr.mxu0 %v139_v32  ;;  %v238_v25 = vld [vmem:[#allocation4 + $0x5d8] sm:$0xff]  ;;  %v205_v28 = vld [vmem:[#allocation4 + $0x4d0] sm:$0xff]  ;;  %v204_v32 = vld [vmem:[#allocation4 + $0x4c8] sm:$0xff] }
  0x40   :  { %1865 = vmatprep.subr.mxu1 %v171_v33  ;;  %1831 = vmatpush3.msra.mxu0 %v123_v34  ;;  %v190_v26 = vld [vmem:[#allocation4 + $0x458] sm:$0xff]  ;;  %v237_v29 = vld [vmem:[#allocation4 + $0x5d0] sm:$0xff]  ;;  %v236_v33 = vld [vmem:[#allocation4 + $0x5c8] sm:$0xff] }
  0x41   :  { %1866 = vmatpush3.msra.mxu1 %v155_v35  ;;  %1832 = vmatprep.subr.mxu0 %v138_v36  ;;  %v222_v27 = vld [vmem:[#allocation4 + $0x558] sm:$0xff]  ;;  %v189_v30 = vld [vmem:[#allocation4 + $0x450] sm:$0xff]  ;;  %v188_v34 = vld [vmem:[#allocation4 + $0x448] sm:$0xff] }
  0x42   :  { %1867 = vmatprep.subr.mxu1 %v170_v37  ;;  %1833 = vmatpush3.msra.mxu0 %v122_v38  ;;  %v221_v31 = vld [vmem:[#allocation4 + $0x550] sm:$0xff]  ;;  %v220_v35 = vld [vmem:[#allocation4 + $0x548] sm:$0xff]  ;;  %v203_v36 = vld [vmem:[#allocation4 + $0x4c0] sm:$0xff] }
  0x43   :  { %1868 = vmatpush3.msra.mxu1 %v154_v39  ;;  %1834 = vmatprep.subr.mxu0 %v137_v40  ;;  %v235_v37 = vld [vmem:[#allocation4 + $0x5c0] sm:$0xff]  ;;  %v202_v40 = vld [vmem:[#allocation4 + $0x4b8] sm:$0xff] }
  0x44   :  { %1869 = vmatprep.subr.mxu1 %v169_v41  ;;  %1835 = vmatpush3.msra.mxu0 %v121_v42  ;;  %v187_v38 = vld [vmem:[#allocation4 + $0x440] sm:$0xff]  ;;  %v234_v41 = vld [vmem:[#allocation4 + $0x5b8] sm:$0xff] }
  0x45   :  { %1870 = vmatpush3.msra.mxu1 %v153_v43  ;;  %1836 = vmatprep.subr.mxu0 %v136_v44  ;;  %v219_v39 = vld [vmem:[#allocation4 + $0x540] sm:$0xff]  ;;  %v186_v42 = vld [vmem:[#allocation4 + $0x438] sm:$0xff]  ;;  %v201_v44 = vld [vmem:[#allocation4 + $0x4b0] sm:$0xff] }
  0x46   :  { %1871 = vmatprep.subr.mxu1 %v168_v45  ;;  %1837 = vmatpush3.msra.mxu0 %v120_v46  ;;  %v218_v43 = vld [vmem:[#allocation4 + $0x538] sm:$0xff]  ;;  %v233_v45 = vld [vmem:[#allocation4 + $0x5b0] sm:$0xff] }
  0x47   :  { %1872 = vmatpush3.msra.mxu1 %v152_v47  ;;  %1838 = vmatprep.subr.mxu0 %v135_v48  ;;  %v185_v46 = vld [vmem:[#allocation4 + $0x430] sm:$0xff]  ;;  %v200_v48 = vld [vmem:[#allocation4 + $0x4a8] sm:$0xff] }
  0x48   :  { %1873 = vmatprep.subr.mxu1 %v167_v49  ;;  %1839 = vmatpush3.msra.mxu0 %v119_v50  ;;  %v217_v47 = vld [vmem:[#allocation4 + $0x530] sm:$0xff]  ;;  %v232_v49 = vld [vmem:[#allocation4 + $0x5a8] sm:$0xff] }
  0x49   :  { %1874 = vmatpush3.msra.mxu1 %v151_v51  ;;  %1840 = vmatprep.subr.mxu0 %v134_v52  ;;  %v184_v50 = vld [vmem:[#allocation4 + $0x428] sm:$0xff]  ;;  %v199_v52 = vld [vmem:[#allocation4 + $0x4a0] sm:$0xff] }
  0x4a   :  { %1875 = vmatprep.subr.mxu1 %v166_v53  ;;  %1841 = vmatpush3.msra.mxu0 %v118_v54  ;;  %v216_v51 = vld [vmem:[#allocation4 + $0x528] sm:$0xff]  ;;  %v231_v53 = vld [vmem:[#allocation4 + $0x5a0] sm:$0xff] }
  0x4b   :  { %1876 = vmatpush3.msra.mxu1 %v150_v55  ;;  %1842 = vmatprep.subr.mxu0 %v133_v56  ;;  %v183_v54 = vld [vmem:[#allocation4 + $0x420] sm:$0xff]  ;;  %v198_v56 = vld [vmem:[#allocation4 + $0x498] sm:$0xff] }
  0x4c   :  { %1877 = vmatprep.subr.mxu1 %v165_v57  ;;  %1843 = vmatpush3.msra.mxu0 %v117_v58  ;;  %v215_v55 = vld [vmem:[#allocation4 + $0x520] sm:$0xff]  ;;  %v230_v57 = vld [vmem:[#allocation4 + $0x598] sm:$0xff] }
  0x4d   :  { %1878 = vmatpush3.msra.mxu1 %v149_v59  ;;  %1844 = vmatprep.subr.mxu0 %v132_v61  ;;  %v182_v58 = vld [vmem:[#allocation4 + $0x418] sm:$0xff]  ;;  %v229_v61 = vld [vmem:[#allocation4 + $0x590] sm:$0xff] }
  0x4e   :  { %1879 = vmatprep.subr.mxu1 %v164_v62  ;;  %1845 = vmatpush3.msra.mxu0 %v116_v63  ;;  %v214_v59 = vld [vmem:[#allocation4 + $0x518] sm:$0xff]  ;;  %v181_v62 = vld [vmem:[#allocation4 + $0x410] sm:$0xff] }
  0x4f   :  { %1880 = vmatpush3.msra.mxu1 %v148_v0  ;;  %1846 = vmatprep.subr.mxu0 %v131_v2  ;;  %v213_v63 = vld [vmem:[#allocation4 + $0x510] sm:$0xff]  ;;  %v39_v0 = vld [vmem:[%s2429_s0 + $0x20] sm:$0xff]  ;;  %v228_v2 = vld [vmem:[#allocation4 + $0x588] sm:$0xff] }
  0x50   :  { %1881 = vmatprep.subr.mxu1 %v163_v3  ;;  %1847 = vmatpush3.msra.mxu0 %v115_v5  ;;  %v180_v3 = vld [vmem:[#allocation4 + $0x408] sm:$0xff] }
  0x51   :  { %815 = vmatprep.mubr.f32.mxu0 %v581_v4  ;;  %1882 = vmatpush3.msra.mxu1 %v147_v6  ;;  %v212_v4 = vld [vmem:[#allocation4 + $0x508] sm:$0xff]  ;;  %v195_v6 = vld [vmem:[#allocation4 + $0x480] sm:$0xff] }
  0x52   :  { %816 = vmatmul.mubr.f32.vlgmr.msra.gmra.mxu0 %v37_v60  ;;  %885 = vmatprep.mubr.f32.mxu1 %v582_v7  ;;  %v197_v60 = vld [vmem:[#allocation4 + $0x490] sm:$0xff]  ;;  %v40_v5 = vld [vmem:[%s2429_s0 + $0x28] sm:$0xff] }
  0x53   :  { %1886 = vmatprep.subr.mxu0 %v210_v8  ;;  %1921 = vmatprep.subr.mxu1 %v242_v9  ;;  %v227_v7 = vld [vmem:[#allocation4 + $0x580] sm:$0xff]  ;;  %v583_v8 = vcombine.high %v39_v0, %v39_v0 }
  0x54   :  { %886 = vmatmul.mubr.f32.vlgmr.msra.gmra.mxu1 %v38_v1  ;;  %1887 = vmatpush3.msra.mxu0 %v194_v10  ;;  %v196_v1 = vld [vmem:[#allocation4 + $0x488] sm:$0xff]  ;;  %v179_v9 = vld [vmem:[#allocation4 + $0x400] sm:$0xff] }
  0x55   :  { %1922 = vmatpush3.msra.mxu1 %v226_v11  ;;  %1888 = vmatprep.subr.mxu0 %v209_v12  ;;  %v211_v10 = vld [vmem:[#allocation4 + $0x500] sm:$0xff]  ;;  %v584_v11 = vcombine.high %v40_v5, %v40_v5  ;;  %v274_v12 = vld [vmem:[#allocation4 + $0x6f8] sm:$0xff] }
  0x56   :  { %1923 = vmatprep.subr.mxu1 %v241_v13  ;;  %1889 = vmatpush3.msra.mxu0 %v193_v14  ;;  %v306_v13 = vld [vmem:[#allocation4 + $0x7f8] sm:$0xff] }
  0x57   :  { %1924 = vmatpush3.msra.mxu1 %v225_v15  ;;  %1890 = vmatprep.subr.mxu0 %v208_v16  ;;  %v258_v14 = vld [vmem:[#allocation4 + $0x678] sm:$0xff]  ;;  %v273_v16 = vld [vmem:[#allocation4 + $0x6f0] sm:$0xff] }
  0x58   :  { %1925 = vmatprep.subr.mxu1 %v240_v17  ;;  %1891 = vmatpush3.msra.mxu0 %v192_v18  ;;  %v290_v15 = vld [vmem:[#allocation4 + $0x778] sm:$0xff]  ;;  %v305_v17 = vld [vmem:[#allocation4 + $0x7f0] sm:$0xff] }
  0x59   :  { %1926 = vmatpush3.msra.mxu1 %v224_v19  ;;  %1892 = vmatprep.subr.mxu0 %v207_v20  ;;  %v257_v18 = vld [vmem:[#allocation4 + $0x670] sm:$0xff]  ;;  %v272_v20 = vld [vmem:[#allocation4 + $0x6e8] sm:$0xff] }
  0x5a   :  { %1927 = vmatprep.subr.mxu1 %v239_v21  ;;  %1893 = vmatpush3.msra.mxu0 %v191_v22  ;;  %v289_v19 = vld [vmem:[#allocation4 + $0x770] sm:$0xff]  ;;  %v304_v21 = vld [vmem:[#allocation4 + $0x7e8] sm:$0xff] }
  0x5b   :  { %1928 = vmatpush3.msra.mxu1 %v223_v23  ;;  %1894 = vmatprep.subr.mxu0 %v206_v24  ;;  %v256_v22 = vld [vmem:[#allocation4 + $0x668] sm:$0xff]  ;;  %v271_v24 = vld [vmem:[#allocation4 + $0x6e0] sm:$0xff] }
  0x5c   :  { %1929 = vmatprep.subr.mxu1 %v238_v25  ;;  %1895 = vmatpush3.msra.mxu0 %v190_v26  ;;  %v288_v23 = vld [vmem:[#allocation4 + $0x768] sm:$0xff]  ;;  %v303_v25 = vld [vmem:[#allocation4 + $0x7e0] sm:$0xff] }
  0x5d   :  { %1930 = vmatpush3.msra.mxu1 %v222_v27  ;;  %1896 = vmatprep.subr.mxu0 %v205_v28  ;;  %v255_v26 = vld [vmem:[#allocation4 + $0x660] sm:$0xff]  ;;  %v270_v28 = vld [vmem:[#allocation4 + $0x6d8] sm:$0xff] }
  0x5e   :  { %1931 = vmatprep.subr.mxu1 %v237_v29  ;;  %1897 = vmatpush3.msra.mxu0 %v189_v30  ;;  %v287_v27 = vld [vmem:[#allocation4 + $0x760] sm:$0xff]  ;;  %v302_v29 = vld [vmem:[#allocation4 + $0x7d8] sm:$0xff] }
  0x5f   :  { %1932 = vmatpush3.msra.mxu1 %v221_v31  ;;  %1898 = vmatprep.subr.mxu0 %v204_v32  ;;  %v254_v30 = vld [vmem:[#allocation4 + $0x658] sm:$0xff]  ;;  %v269_v32 = vld [vmem:[#allocation4 + $0x6d0] sm:$0xff] }
  0x60   :  { %1933 = vmatprep.subr.mxu1 %v236_v33  ;;  %1899 = vmatpush3.msra.mxu0 %v188_v34  ;;  %v286_v31 = vld [vmem:[#allocation4 + $0x758] sm:$0xff]  ;;  %v301_v33 = vld [vmem:[#allocation4 + $0x7d0] sm:$0xff] }
  0x61   :  { %1934 = vmatpush3.msra.mxu1 %v220_v35  ;;  %1900 = vmatprep.subr.mxu0 %v203_v36  ;;  %v253_v34 = vld [vmem:[#allocation4 + $0x650] sm:$0xff]  ;;  %v268_v36 = vld [vmem:[#allocation4 + $0x6c8] sm:$0xff] }
  0x62   :  { %1935 = vmatprep.subr.mxu1 %v235_v37  ;;  %1901 = vmatpush3.msra.mxu0 %v187_v38  ;;  %v285_v35 = vld [vmem:[#allocation4 + $0x750] sm:$0xff]  ;;  %v300_v37 = vld [vmem:[#allocation4 + $0x7c8] sm:$0xff] }
  0x63   :  { %1936 = vmatpush3.msra.mxu1 %v219_v39  ;;  %1902 = vmatprep.subr.mxu0 %v202_v40  ;;  %v252_v38 = vld [vmem:[#allocation4 + $0x648] sm:$0xff]  ;;  %v267_v40 = vld [vmem:[#allocation4 + $0x6c0] sm:$0xff] }
  0x64   :  { %1937 = vmatprep.subr.mxu1 %v234_v41  ;;  %1903 = vmatpush3.msra.mxu0 %v186_v42  ;;  %v284_v39 = vld [vmem:[#allocation4 + $0x748] sm:$0xff]  ;;  %v299_v41 = vld [vmem:[#allocation4 + $0x7c0] sm:$0xff] }
  0x65   :  { %1938 = vmatpush3.msra.mxu1 %v218_v43  ;;  %1904 = vmatprep.subr.mxu0 %v201_v44  ;;  %v251_v42 = vld [vmem:[#allocation4 + $0x640] sm:$0xff]  ;;  %v266_v44 = vld [vmem:[#allocation4 + $0x6b8] sm:$0xff] }
  0x66   :  { %1939 = vmatprep.subr.mxu1 %v233_v45  ;;  %1905 = vmatpush3.msra.mxu0 %v185_v46  ;;  %v283_v43 = vld [vmem:[#allocation4 + $0x740] sm:$0xff]  ;;  %v298_v45 = vld [vmem:[#allocation4 + $0x7b8] sm:$0xff] }
  0x67   :  { %1940 = vmatpush3.msra.mxu1 %v217_v47  ;;  %1906 = vmatprep.subr.mxu0 %v200_v48  ;;  %v250_v46 = vld [vmem:[#allocation4 + $0x638] sm:$0xff]  ;;  %v265_v48 = vld [vmem:[#allocation4 + $0x6b0] sm:$0xff] }
  0x68   :  { %1941 = vmatprep.subr.mxu1 %v232_v49  ;;  %1907 = vmatpush3.msra.mxu0 %v184_v50  ;;  %v282_v47 = vld [vmem:[#allocation4 + $0x738] sm:$0xff]  ;;  %v297_v49 = vld [vmem:[#allocation4 + $0x7b0] sm:$0xff] }
  0x69   :  { %1942 = vmatpush3.msra.mxu1 %v216_v51  ;;  %1908 = vmatprep.subr.mxu0 %v199_v52  ;;  %v249_v50 = vld [vmem:[#allocation4 + $0x630] sm:$0xff]  ;;  %v264_v52 = vld [vmem:[#allocation4 + $0x6a8] sm:$0xff] }
  0x6a   :  { %1943 = vmatprep.subr.mxu1 %v231_v53  ;;  %1909 = vmatpush3.msra.mxu0 %v183_v54  ;;  %v281_v51 = vld [vmem:[#allocation4 + $0x730] sm:$0xff]  ;;  %v296_v53 = vld [vmem:[#allocation4 + $0x7a8] sm:$0xff] }
  0x6b   :  { %1944 = vmatpush3.msra.mxu1 %v215_v55  ;;  %1910 = vmatprep.subr.mxu0 %v198_v56  ;;  %v248_v54 = vld [vmem:[#allocation4 + $0x628] sm:$0xff]  ;;  %v263_v56 = vld [vmem:[#allocation4 + $0x6a0] sm:$0xff] }
  0x6c   :  { %1945 = vmatprep.subr.mxu1 %v230_v57  ;;  %1911 = vmatpush3.msra.mxu0 %v182_v58  ;;  %v280_v55 = vld [vmem:[#allocation4 + $0x728] sm:$0xff]  ;;  %v295_v57 = vld [vmem:[#allocation4 + $0x7a0] sm:$0xff] }
  0x6d   :  { %1946 = vmatpush3.msra.mxu1 %v214_v59  ;;  %1912 = vmatprep.subr.mxu0 %v197_v60  ;;  %v247_v58 = vld [vmem:[#allocation4 + $0x620] sm:$0xff]  ;;  %v262_v60 = vld [vmem:[#allocation4 + $0x698] sm:$0xff] }
  0x6e   :  { %1947 = vmatprep.subr.mxu1 %v229_v61  ;;  %1913 = vmatpush3.msra.mxu0 %v181_v62  ;;  %v279_v59 = vld [vmem:[#allocation4 + $0x720] sm:$0xff]  ;;  %v294_v61 = vld [vmem:[#allocation4 + $0x798] sm:$0xff] }
  0x6f   :  { %1948 = vmatpush3.msra.mxu1 %v213_v63  ;;  %1914 = vmatprep.subr.mxu0 %v196_v1  ;;  %v246_v62 = vld [vmem:[#allocation4 + $0x618] sm:$0xff]  ;;  %v293_v1 = vld [vmem:[#allocation4 + $0x790] sm:$0xff] }
  0x70   :  { %1949 = vmatprep.subr.mxu1 %v228_v2  ;;  %1915 = vmatpush3.msra.mxu0 %v180_v3  ;;  %v278_v63 = vld [vmem:[#allocation4 + $0x718] sm:$0xff]  ;;  %v245_v2 = vld [vmem:[#allocation4 + $0x610] sm:$0xff] }
  0x71   :  { %1950 = vmatpush3.msra.mxu1 %v212_v4  ;;  %1916 = vmatprep.subr.mxu0 %v195_v6  ;;  %v277_v3 = vld [vmem:[#allocation4 + $0x710] sm:$0xff]  ;;  %v292_v6 = vld [vmem:[#allocation4 + $0x788] sm:$0xff] }
  0x72   :  { %1951 = vmatprep.subr.mxu1 %v227_v7  ;;  %1917 = vmatpush3.msra.mxu0 %v179_v9  ;;  %v41_v4 = vld [vmem:[%s2429_s0 + $0x30] sm:$0xff]  ;;  %v42_v9 = vld [vmem:[%s2429_s0 + $0x38] sm:$0xff] }
  0x73   :  { %955 = vmatprep.mubr.f32.mxu0 %v583_v8  ;;  %1952 = vmatpush3.msra.mxu1 %v211_v10  ;;  %v244_v7 = vld [vmem:[#allocation4 + $0x608] sm:$0xff]  ;;  %v259_v10 = vld [vmem:[#allocation4 + $0x680] sm:$0xff] }
  0x74   :  { %956 = vmatmul.mubr.f32.vlgmr.msra.gmra.mxu0 %v39_v0  ;;  %1025 = vmatprep.mubr.f32.mxu1 %v584_v11  ;;  %v261_v0 = vld [vmem:[#allocation4 + $0x690] sm:$0xff]  ;;  %v276_v8 = vld [vmem:[#allocation4 + $0x708] sm:$0xff]  ;;  %v291_v11 = vld [vmem:[#allocation4 + $0x780] sm:$0xff] }
  0x75   :  { %1956 = vmatprep.subr.mxu0 %v274_v12  ;;  %1991 = vmatprep.subr.mxu1 %v306_v13  ;;  %v585_v12 = vcombine.high %v41_v4, %v41_v4  ;;  %v243_v13 = vld [vmem:[#allocation4 + $0x600] sm:$0xff] }
  0x76   :  { %1026 = vmatmul.mubr.f32.vlgmr.msra.gmra.mxu1 %v40_v5  ;;  %1957 = vmatpush3.msra.mxu0 %v258_v14  ;;  %v260_v5 = vld [vmem:[#allocation4 + $0x688] sm:$0xff]  ;;  %v275_v14 = vld [vmem:[#allocation4 + $0x700] sm:$0xff] }
  0x77   :  { %1992 = vmatpush3.msra.mxu1 %v290_v15  ;;  %1958 = vmatprep.subr.mxu0 %v273_v16  ;;  %v586_v15 = vcombine.high %v42_v9, %v42_v9  ;;  %v338_v16 = vld [vmem:[#allocation4 + $0x8f8] sm:$0xff] }
  0x78   :  { %1993 = vmatprep.subr.mxu1 %v305_v17  ;;  %1959 = vmatpush3.msra.mxu0 %v257_v18  ;;  %v370_v17 = vld [vmem:[#allocation4 + $0x9f8] sm:$0xff] }
  0x79   :  { %1994 = vmatpush3.msra.mxu1 %v289_v19  ;;  %1960 = vmatprep.subr.mxu0 %v272_v20  ;;  %v322_v18 = vld [vmem:[#allocation4 + $0x878] sm:$0xff]  ;;  %v337_v20 = vld [vmem:[#allocation4 + $0x8f0] sm:$0xff] }
  0x7a   :  { %1995 = vmatprep.subr.mxu1 %v304_v21  ;;  %1961 = vmatpush3.msra.mxu0 %v256_v22  ;;  %v354_v19 = vld [vmem:[#allocation4 + $0x978] sm:$0xff]  ;;  %v369_v21 = vld [vmem:[#allocation4 + $0x9f0] sm:$0xff] }
  0x7b   :  { %1996 = vmatpush3.msra.mxu1 %v288_v23  ;;  %1962 = vmatprep.subr.mxu0 %v271_v24  ;;  %v321_v22 = vld [vmem:[#allocation4 + $0x870] sm:$0xff]  ;;  %v336_v24 = vld [vmem:[#allocation4 + $0x8e8] sm:$0xff] }
  0x7c   :  { %1997 = vmatprep.subr.mxu1 %v303_v25  ;;  %1963 = vmatpush3.msra.mxu0 %v255_v26  ;;  %v353_v23 = vld [vmem:[#allocation4 + $0x970] sm:$0xff]  ;;  %v368_v25 = vld [vmem:[#allocation4 + $0x9e8] sm:$0xff] }
  0x7d   :  { %1998 = vmatpush3.msra.mxu1 %v287_v27  ;;  %1964 = vmatprep.subr.mxu0 %v270_v28  ;;  %v320_v26 = vld [vmem:[#allocation4 + $0x868] sm:$0xff]  ;;  %v335_v28 = vld [vmem:[#allocation4 + $0x8e0] sm:$0xff] }
  0x7e   :  { %1999 = vmatprep.subr.mxu1 %v302_v29  ;;  %1965 = vmatpush3.msra.mxu0 %v254_v30  ;;  %v352_v27 = vld [vmem:[#allocation4 + $0x968] sm:$0xff]  ;;  %v367_v29 = vld [vmem:[#allocation4 + $0x9e0] sm:$0xff] }
  0x7f   :  { %2000 = vmatpush3.msra.mxu1 %v286_v31  ;;  %1966 = vmatprep.subr.mxu0 %v269_v32  ;;  %v319_v30 = vld [vmem:[#allocation4 + $0x860] sm:$0xff]  ;;  %v334_v32 = vld [vmem:[#allocation4 + $0x8d8] sm:$0xff] }
  0x80   :  { %2001 = vmatprep.subr.mxu1 %v301_v33  ;;  %1967 = vmatpush3.msra.mxu0 %v253_v34  ;;  %v351_v31 = vld [vmem:[#allocation4 + $0x960] sm:$0xff]  ;;  %v366_v33 = vld [vmem:[#allocation4 + $0x9d8] sm:$0xff] }
  0x81   :  { %2002 = vmatpush3.msra.mxu1 %v285_v35  ;;  %1968 = vmatprep.subr.mxu0 %v268_v36  ;;  %v318_v34 = vld [vmem:[#allocation4 + $0x858] sm:$0xff]  ;;  %v333_v36 = vld [vmem:[#allocation4 + $0x8d0] sm:$0xff] }
  0x82   :  { %2003 = vmatprep.subr.mxu1 %v300_v37  ;;  %1969 = vmatpush3.msra.mxu0 %v252_v38  ;;  %v350_v35 = vld [vmem:[#allocation4 + $0x958] sm:$0xff]  ;;  %v365_v37 = vld [vmem:[#allocation4 + $0x9d0] sm:$0xff] }
  0x83   :  { %2004 = vmatpush3.msra.mxu1 %v284_v39  ;;  %1970 = vmatprep.subr.mxu0 %v267_v40  ;;  %v317_v38 = vld [vmem:[#allocation4 + $0x850] sm:$0xff]  ;;  %v332_v40 = vld [vmem:[#allocation4 + $0x8c8] sm:$0xff] }
  0x84   :  { %2005 = vmatprep.subr.mxu1 %v299_v41  ;;  %1971 = vmatpush3.msra.mxu0 %v251_v42  ;;  %v349_v39 = vld [vmem:[#allocation4 + $0x950] sm:$0xff]  ;;  %v364_v41 = vld [vmem:[#allocation4 + $0x9c8] sm:$0xff] }
  0x85   :  { %2006 = vmatpush3.msra.mxu1 %v283_v43  ;;  %1972 = vmatprep.subr.mxu0 %v266_v44  ;;  %v316_v42 = vld [vmem:[#allocation4 + $0x848] sm:$0xff]  ;;  %v331_v44 = vld [vmem:[#allocation4 + $0x8c0] sm:$0xff] }
  0x86   :  { %2007 = vmatprep.subr.mxu1 %v298_v45  ;;  %1973 = vmatpush3.msra.mxu0 %v250_v46  ;;  %v348_v43 = vld [vmem:[#allocation4 + $0x948] sm:$0xff]  ;;  %v363_v45 = vld [vmem:[#allocation4 + $0x9c0] sm:$0xff] }
  0x87   :  { %2008 = vmatpush3.msra.mxu1 %v282_v47  ;;  %1974 = vmatprep.subr.mxu0 %v265_v48  ;;  %v315_v46 = vld [vmem:[#allocation4 + $0x840] sm:$0xff]  ;;  %v330_v48 = vld [vmem:[#allocation4 + $0x8b8] sm:$0xff] }
  0x88   :  { %2009 = vmatprep.subr.mxu1 %v297_v49  ;;  %1975 = vmatpush3.msra.mxu0 %v249_v50  ;;  %v347_v47 = vld [vmem:[#allocation4 + $0x940] sm:$0xff]  ;;  %v362_v49 = vld [vmem:[#allocation4 + $0x9b8] sm:$0xff] }
  0x89   :  { %2010 = vmatpush3.msra.mxu1 %v281_v51  ;;  %1976 = vmatprep.subr.mxu0 %v264_v52  ;;  %v314_v50 = vld [vmem:[#allocation4 + $0x838] sm:$0xff]  ;;  %v329_v52 = vld [vmem:[#allocation4 + $0x8b0] sm:$0xff] }
  0x8a   :  { %2011 = vmatprep.subr.mxu1 %v296_v53  ;;  %1977 = vmatpush3.msra.mxu0 %v248_v54  ;;  %v346_v51 = vld [vmem:[#allocation4 + $0x938] sm:$0xff]  ;;  %v361_v53 = vld [vmem:[#allocation4 + $0x9b0] sm:$0xff] }
  0x8b   :  { %2012 = vmatpush3.msra.mxu1 %v280_v55  ;;  %1978 = vmatprep.subr.mxu0 %v263_v56  ;;  %v313_v54 = vld [vmem:[#allocation4 + $0x830] sm:$0xff]  ;;  %v328_v56 = vld [vmem:[#allocation4 + $0x8a8] sm:$0xff] }
  0x8c   :  { %2013 = vmatprep.subr.mxu1 %v295_v57  ;;  %1979 = vmatpush3.msra.mxu0 %v247_v58  ;;  %v345_v55 = vld [vmem:[#allocation4 + $0x930] sm:$0xff]  ;;  %v360_v57 = vld [vmem:[#allocation4 + $0x9a8] sm:$0xff] }
  0x8d   :  { %2014 = vmatpush3.msra.mxu1 %v279_v59  ;;  %1980 = vmatprep.subr.mxu0 %v262_v60  ;;  %v312_v58 = vld [vmem:[#allocation4 + $0x828] sm:$0xff]  ;;  %v327_v60 = vld [vmem:[#allocation4 + $0x8a0] sm:$0xff] }
  0x8e   :  { %2015 = vmatprep.subr.mxu1 %v294_v61  ;;  %1981 = vmatpush3.msra.mxu0 %v246_v62  ;;  %v344_v59 = vld [vmem:[#allocation4 + $0x928] sm:$0xff]  ;;  %v359_v61 = vld [vmem:[#allocation4 + $0x9a0] sm:$0xff] }
  0x8f   :  { %2016 = vmatpush3.msra.mxu1 %v278_v63  ;;  %1982 = vmatprep.subr.mxu0 %v261_v0  ;;  %v311_v62 = vld [vmem:[#allocation4 + $0x820] sm:$0xff]  ;;  %v326_v0 = vld [vmem:[#allocation4 + $0x898] sm:$0xff] }
  0x90   :  { %2017 = vmatprep.subr.mxu1 %v293_v1  ;;  %1983 = vmatpush3.msra.mxu0 %v245_v2  ;;  %v343_v63 = vld [vmem:[#allocation4 + $0x920] sm:$0xff]  ;;  %v358_v1 = vld [vmem:[#allocation4 + $0x998] sm:$0xff] }
  0x91   :  { %2018 = vmatpush3.msra.mxu1 %v277_v3  ;;  %1984 = vmatprep.subr.mxu0 %v260_v5  ;;  %v310_v2 = vld [vmem:[#allocation4 + $0x818] sm:$0xff]  ;;  %v357_v5 = vld [vmem:[#allocation4 + $0x990] sm:$0xff] }
  0x92   :  { %2019 = vmatprep.subr.mxu1 %v292_v6  ;;  %1985 = vmatpush3.msra.mxu0 %v244_v7  ;;  %v342_v3 = vld [vmem:[#allocation4 + $0x918] sm:$0xff]  ;;  %v309_v6 = vld [vmem:[#allocation4 + $0x810] sm:$0xff] }
  0x93   :  { %2020 = vmatpush3.msra.mxu1 %v276_v8  ;;  %1986 = vmatprep.subr.mxu0 %v259_v10  ;;  %v341_v7 = vld [vmem:[#allocation4 + $0x910] sm:$0xff]  ;;  %v43_v8 = vld [vmem:[%s2429_s0 + $0x40] sm:$0xff]  ;;  %v356_v10 = vld [vmem:[#allocation4 + $0x988] sm:$0xff] }
  0x94   :  { %2021 = vmatprep.subr.mxu1 %v291_v11  ;;  %1987 = vmatpush3.msra.mxu0 %v243_v13  ;;  %v308_v11 = vld [vmem:[#allocation4 + $0x808] sm:$0xff] }
  0x95   :  { %1095 = vmatprep.mubr.f32.mxu0 %v585_v12  ;;  %2022 = vmatpush3.msra.mxu1 %v275_v14  ;;  %v340_v12 = vld [vmem:[#allocation4 + $0x908] sm:$0xff]  ;;  %v323_v14 = vld [vmem:[#allocation4 + $0x880] sm:$0xff] }
  0x96   :  { %1096 = vmatmul.mubr.f32.vlgmr.msra.gmra.mxu0 %v41_v4  ;;  %1165 = vmatprep.mubr.f32.mxu1 %v586_v15  ;;  %v325_v4 = vld [vmem:[#allocation4 + $0x890] sm:$0xff]  ;;  %v44_v13 = vld [vmem:[%s2429_s0 + $0x48] sm:$0xff] }
  0x97   :  { %2026 = vmatprep.subr.mxu0 %v338_v16  ;;  %2061 = vmatprep.subr.mxu1 %v370_v17  ;;  %v355_v15 = vld [vmem:[#allocation4 + $0x980] sm:$0xff]  ;;  %v587_v16 = vcombine.high %v43_v8, %v43_v8 }
  0x98   :  { %1166 = vmatmul.mubr.f32.vlgmr.msra.gmra.mxu1 %v42_v9  ;;  %2027 = vmatpush3.msra.mxu0 %v322_v18  ;;  %v324_v9 = vld [vmem:[#allocation4 + $0x888] sm:$0xff]  ;;  %v307_v17 = vld [vmem:[#allocation4 + $0x800] sm:$0xff] }
  0x99   :  { %2062 = vmatpush3.msra.mxu1 %v354_v19  ;;  %2028 = vmatprep.subr.mxu0 %v337_v20  ;;  %v339_v18 = vld [vmem:[#allocation4 + $0x900] sm:$0xff]  ;;  %v588_v19 = vcombine.high %v44_v13, %v44_v13  ;;  %v402_v20 = vld [vmem:[#allocation4 + $0xaf8] sm:$0xff] }
  0x9a   :  { %2063 = vmatprep.subr.mxu1 %v369_v21  ;;  %2029 = vmatpush3.msra.mxu0 %v321_v22  ;;  %v434_v21 = vld [vmem:[#allocation4 + $0xbf8] sm:$0xff] }
  0x9b   :  { %2064 = vmatpush3.msra.mxu1 %v353_v23  ;;  %2030 = vmatprep.subr.mxu0 %v336_v24  ;;  %v386_v22 = vld [vmem:[#allocation4 + $0xa78] sm:$0xff]  ;;  %v401_v24 = vld [vmem:[#allocation4 + $0xaf0] sm:$0xff] }
  0x9c   :  { %2065 = vmatprep.subr.mxu1 %v368_v25  ;;  %2031 = vmatpush3.msra.mxu0 %v320_v26  ;;  %v418_v23 = vld [vmem:[#allocation4 + $0xb78] sm:$0xff]  ;;  %v433_v25 = vld [vmem:[#allocation4 + $0xbf0] sm:$0xff] }
  0x9d   :  { %2066 = vmatpush3.msra.mxu1 %v352_v27  ;;  %2032 = vmatprep.subr.mxu0 %v335_v28  ;;  %v385_v26 = vld [vmem:[#allocation4 + $0xa70] sm:$0xff]  ;;  %v400_v28 = vld [vmem:[#allocation4 + $0xae8] sm:$0xff] }
  0x9e   :  { %2067 = vmatprep.subr.mxu1 %v367_v29  ;;  %2033 = vmatpush3.msra.mxu0 %v319_v30  ;;  %v417_v27 = vld [vmem:[#allocation4 + $0xb70] sm:$0xff]  ;;  %v432_v29 = vld [vmem:[#allocation4 + $0xbe8] sm:$0xff] }
  0x9f   :  { %2068 = vmatpush3.msra.mxu1 %v351_v31  ;;  %2034 = vmatprep.subr.mxu0 %v334_v32  ;;  %v384_v30 = vld [vmem:[#allocation4 + $0xa68] sm:$0xff]  ;;  %v399_v32 = vld [vmem:[#allocation4 + $0xae0] sm:$0xff] }
  0xa0   :  { %2069 = vmatprep.subr.mxu1 %v366_v33  ;;  %2035 = vmatpush3.msra.mxu0 %v318_v34  ;;  %v416_v31 = vld [vmem:[#allocation4 + $0xb68] sm:$0xff]  ;;  %v431_v33 = vld [vmem:[#allocation4 + $0xbe0] sm:$0xff] }
  0xa1   :  { %2070 = vmatpush3.msra.mxu1 %v350_v35  ;;  %2036 = vmatprep.subr.mxu0 %v333_v36  ;;  %v383_v34 = vld [vmem:[#allocation4 + $0xa60] sm:$0xff]  ;;  %v398_v36 = vld [vmem:[#allocation4 + $0xad8] sm:$0xff] }
  0xa2   :  { %2071 = vmatprep.subr.mxu1 %v365_v37  ;;  %2037 = vmatpush3.msra.mxu0 %v317_v38  ;;  %v415_v35 = vld [vmem:[#allocation4 + $0xb60] sm:$0xff]  ;;  %v430_v37 = vld [vmem:[#allocation4 + $0xbd8] sm:$0xff] }
  0xa3   :  { %2072 = vmatpush3.msra.mxu1 %v349_v39  ;;  %2038 = vmatprep.subr.mxu0 %v332_v40  ;;  %v382_v38 = vld [vmem:[#allocation4 + $0xa58] sm:$0xff]  ;;  %v397_v40 = vld [vmem:[#allocation4 + $0xad0] sm:$0xff] }
  0xa4   :  { %2073 = vmatprep.subr.mxu1 %v364_v41  ;;  %2039 = vmatpush3.msra.mxu0 %v316_v42  ;;  %v414_v39 = vld [vmem:[#allocation4 + $0xb58] sm:$0xff]  ;;  %v429_v41 = vld [vmem:[#allocation4 + $0xbd0] sm:$0xff] }
  0xa5   :  { %2074 = vmatpush3.msra.mxu1 %v348_v43  ;;  %2040 = vmatprep.subr.mxu0 %v331_v44  ;;  %v381_v42 = vld [vmem:[#allocation4 + $0xa50] sm:$0xff]  ;;  %v396_v44 = vld [vmem:[#allocation4 + $0xac8] sm:$0xff] }
  0xa6   :  { %2075 = vmatprep.subr.mxu1 %v363_v45  ;;  %2041 = vmatpush3.msra.mxu0 %v315_v46  ;;  %v413_v43 = vld [vmem:[#allocation4 + $0xb50] sm:$0xff]  ;;  %v428_v45 = vld [vmem:[#allocation4 + $0xbc8] sm:$0xff] }
  0xa7   :  { %2076 = vmatpush3.msra.mxu1 %v347_v47  ;;  %2042 = vmatprep.subr.mxu0 %v330_v48  ;;  %v380_v46 = vld [vmem:[#allocation4 + $0xa48] sm:$0xff]  ;;  %v395_v48 = vld [vmem:[#allocation4 + $0xac0] sm:$0xff] }
  0xa8   :  { %2077 = vmatprep.subr.mxu1 %v362_v49  ;;  %2043 = vmatpush3.msra.mxu0 %v314_v50  ;;  %v412_v47 = vld [vmem:[#allocation4 + $0xb48] sm:$0xff]  ;;  %v427_v49 = vld [vmem:[#allocation4 + $0xbc0] sm:$0xff] }
  0xa9   :  { %2078 = vmatpush3.msra.mxu1 %v346_v51  ;;  %2044 = vmatprep.subr.mxu0 %v329_v52  ;;  %v379_v50 = vld [vmem:[#allocation4 + $0xa40] sm:$0xff]  ;;  %v394_v52 = vld [vmem:[#allocation4 + $0xab8] sm:$0xff] }
  0xaa   :  { %2079 = vmatprep.subr.mxu1 %v361_v53  ;;  %2045 = vmatpush3.msra.mxu0 %v313_v54  ;;  %v411_v51 = vld [vmem:[#allocation4 + $0xb40] sm:$0xff]  ;;  %v426_v53 = vld [vmem:[#allocation4 + $0xbb8] sm:$0xff] }
  0xab   :  { %2080 = vmatpush3.msra.mxu1 %v345_v55  ;;  %2046 = vmatprep.subr.mxu0 %v328_v56  ;;  %v378_v54 = vld [vmem:[#allocation4 + $0xa38] sm:$0xff]  ;;  %v393_v56 = vld [vmem:[#allocation4 + $0xab0] sm:$0xff] }
  0xac   :  { %2081 = vmatprep.subr.mxu1 %v360_v57  ;;  %2047 = vmatpush3.msra.mxu0 %v312_v58  ;;  %v410_v55 = vld [vmem:[#allocation4 + $0xb38] sm:$0xff]  ;;  %v425_v57 = vld [vmem:[#allocation4 + $0xbb0] sm:$0xff] }
  0xad   :  { %2082 = vmatpush3.msra.mxu1 %v344_v59  ;;  %2048 = vmatprep.subr.mxu0 %v327_v60  ;;  %v377_v58 = vld [vmem:[#allocation4 + $0xa30] sm:$0xff]  ;;  %v392_v60 = vld [vmem:[#allocation4 + $0xaa8] sm:$0xff] }
  0xae   :  { %2083 = vmatprep.subr.mxu1 %v359_v61  ;;  %2049 = vmatpush3.msra.mxu0 %v311_v62  ;;  %v409_v59 = vld [vmem:[#allocation4 + $0xb30] sm:$0xff]  ;;  %v424_v61 = vld [vmem:[#allocation4 + $0xba8] sm:$0xff] }
  0xaf   :  { %2084 = vmatpush3.msra.mxu1 %v343_v63  ;;  %2050 = vmatprep.subr.mxu0 %v326_v0  ;;  %v376_v62 = vld [vmem:[#allocation4 + $0xa28] sm:$0xff]  ;;  %v391_v0 = vld [vmem:[#allocation4 + $0xaa0] sm:$0xff] }
  0xb0   :  { %2085 = vmatprep.subr.mxu1 %v358_v1  ;;  %2051 = vmatpush3.msra.mxu0 %v310_v2  ;;  %v408_v63 = vld [vmem:[#allocation4 + $0xb28] sm:$0xff]  ;;  %v423_v1 = vld [vmem:[#allocation4 + $0xba0] sm:$0xff] }
  0xb1   :  { %2086 = vmatpush3.msra.mxu1 %v342_v3  ;;  %2052 = vmatprep.subr.mxu0 %v325_v4  ;;  %v375_v2 = vld [vmem:[#allocation4 + $0xa20] sm:$0xff]  ;;  %v390_v4 = vld [vmem:[#allocation4 + $0xa98] sm:$0xff] }
  0xb2   :  { %2087 = vmatprep.subr.mxu1 %v357_v5  ;;  %2053 = vmatpush3.msra.mxu0 %v309_v6  ;;  %v407_v3 = vld [vmem:[#allocation4 + $0xb20] sm:$0xff]  ;;  %v422_v5 = vld [vmem:[#allocation4 + $0xb98] sm:$0xff] }
  0xb3   :  { %2088 = vmatpush3.msra.mxu1 %v341_v7  ;;  %2054 = vmatprep.subr.mxu0 %v324_v9  ;;  %v374_v6 = vld [vmem:[#allocation4 + $0xa18] sm:$0xff]  ;;  %v421_v9 = vld [vmem:[#allocation4 + $0xb90] sm:$0xff] }
  0xb4   :  { %2089 = vmatprep.subr.mxu1 %v356_v10  ;;  %2055 = vmatpush3.msra.mxu0 %v308_v11  ;;  %v406_v7 = vld [vmem:[#allocation4 + $0xb18] sm:$0xff]  ;;  %v373_v10 = vld [vmem:[#allocation4 + $0xa10] sm:$0xff] }
  0xb5   :  { %2090 = vmatpush3.msra.mxu1 %v340_v12  ;;  %2056 = vmatprep.subr.mxu0 %v323_v14  ;;  %v405_v11 = vld [vmem:[#allocation4 + $0xb10] sm:$0xff]  ;;  %v420_v14 = vld [vmem:[#allocation4 + $0xb88] sm:$0xff] }
  0xb6   :  { %2091 = vmatprep.subr.mxu1 %v355_v15  ;;  %2057 = vmatpush3.msra.mxu0 %v307_v17  ;;  %v45_v12 = vld [vmem:[%s2429_s0 + $0x50] sm:$0xff]  ;;  %v46_v17 = vld [vmem:[%s2429_s0 + $0x58] sm:$0xff] }
  0xb7   :  { %1235 = vmatprep.mubr.f32.mxu0 %v587_v16  ;;  %2092 = vmatpush3.msra.mxu1 %v339_v18  ;;  %v372_v15 = vld [vmem:[#allocation4 + $0xa08] sm:$0xff]  ;;  %v387_v18 = vld [vmem:[#allocation4 + $0xa80] sm:$0xff] }
  0xb8   :  { %1236 = vmatmul.mubr.f32.vlgmr.msra.gmra.mxu0 %v43_v8  ;;  %1305 = vmatprep.mubr.f32.mxu1 %v588_v19  ;;  %v389_v8 = vld [vmem:[#allocation4 + $0xa90] sm:$0xff]  ;;  %v404_v16 = vld [vmem:[#allocation4 + $0xb08] sm:$0xff]  ;;  %v419_v19 = vld [vmem:[#allocation4 + $0xb80] sm:$0xff] }
  0xb9   :  { %2096 = vmatprep.subr.mxu0 %v402_v20  ;;  %2131 = vmatprep.subr.mxu1 %v434_v21  ;;  %v589_v20 = vcombine.high %v45_v12, %v45_v12  ;;  %v371_v21 = vld [vmem:[#allocation4 + $0xa00] sm:$0xff] }
  0xba   :  { %1306 = vmatmul.mubr.f32.vlgmr.msra.gmra.mxu1 %v44_v13  ;;  %2097 = vmatpush3.msra.mxu0 %v386_v22  ;;  %v388_v13 = vld [vmem:[#allocation4 + $0xa88] sm:$0xff]  ;;  %v403_v22 = vld [vmem:[#allocation4 + $0xb00] sm:$0xff] }
  0xbb   :  { %2132 = vmatpush3.msra.mxu1 %v418_v23  ;;  %2098 = vmatprep.subr.mxu0 %v401_v24  ;;  %v590_v23 = vcombine.high %v46_v17, %v46_v17  ;;  %v466_v24 = vld [vmem:[#allocation4 + $0xcf8] sm:$0xff] }
  0xbc   :  { %2133 = vmatprep.subr.mxu1 %v433_v25  ;;  %2099 = vmatpush3.msra.mxu0 %v385_v26  ;;  %v498_v25 = vld [vmem:[#allocation4 + $0xdf8] sm:$0xff] }
  0xbd   :  { %2134 = vmatpush3.msra.mxu1 %v417_v27  ;;  %2100 = vmatprep.subr.mxu0 %v400_v28  ;;  %v450_v26 = vld [vmem:[#allocation4 + $0xc78] sm:$0xff]  ;;  %v465_v28 = vld [vmem:[#allocation4 + $0xcf0] sm:$0xff] }
  0xbe   :  { %2135 = vmatprep.subr.mxu1 %v432_v29  ;;  %2101 = vmatpush3.msra.mxu0 %v384_v30  ;;  %v482_v27 = vld [vmem:[#allocation4 + $0xd78] sm:$0xff]  ;;  %v497_v29 = vld [vmem:[#allocation4 + $0xdf0] sm:$0xff] }
  0xbf   :  { %2136 = vmatpush3.msra.mxu1 %v416_v31  ;;  %2102 = vmatprep.subr.mxu0 %v399_v32  ;;  %v449_v30 = vld [vmem:[#allocation4 + $0xc70] sm:$0xff]  ;;  %v464_v32 = vld [vmem:[#allocation4 + $0xce8] sm:$0xff] }
  0xc0   :  { %2137 = vmatprep.subr.mxu1 %v431_v33  ;;  %2103 = vmatpush3.msra.mxu0 %v383_v34  ;;  %v481_v31 = vld [vmem:[#allocation4 + $0xd70] sm:$0xff]  ;;  %v496_v33 = vld [vmem:[#allocation4 + $0xde8] sm:$0xff] }
  0xc1   :  { %2138 = vmatpush3.msra.mxu1 %v415_v35  ;;  %2104 = vmatprep.subr.mxu0 %v398_v36  ;;  %v448_v34 = vld [vmem:[#allocation4 + $0xc68] sm:$0xff]  ;;  %v463_v36 = vld [vmem:[#allocation4 + $0xce0] sm:$0xff] }
  0xc2   :  { %2139 = vmatprep.subr.mxu1 %v430_v37  ;;  %2105 = vmatpush3.msra.mxu0 %v382_v38  ;;  %v480_v35 = vld [vmem:[#allocation4 + $0xd68] sm:$0xff]  ;;  %v495_v37 = vld [vmem:[#allocation4 + $0xde0] sm:$0xff] }
  0xc3   :  { %2140 = vmatpush3.msra.mxu1 %v414_v39  ;;  %2106 = vmatprep.subr.mxu0 %v397_v40  ;;  %v447_v38 = vld [vmem:[#allocation4 + $0xc60] sm:$0xff]  ;;  %v462_v40 = vld [vmem:[#allocation4 + $0xcd8] sm:$0xff] }
  0xc4   :  { %2141 = vmatprep.subr.mxu1 %v429_v41  ;;  %2107 = vmatpush3.msra.mxu0 %v381_v42  ;;  %v479_v39 = vld [vmem:[#allocation4 + $0xd60] sm:$0xff]  ;;  %v494_v41 = vld [vmem:[#allocation4 + $0xdd8] sm:$0xff] }
  0xc5   :  { %2142 = vmatpush3.msra.mxu1 %v413_v43  ;;  %2108 = vmatprep.subr.mxu0 %v396_v44  ;;  %v446_v42 = vld [vmem:[#allocation4 + $0xc58] sm:$0xff]  ;;  %v461_v44 = vld [vmem:[#allocation4 + $0xcd0] sm:$0xff] }
  0xc6   :  { %2143 = vmatprep.subr.mxu1 %v428_v45  ;;  %2109 = vmatpush3.msra.mxu0 %v380_v46  ;;  %v478_v43 = vld [vmem:[#allocation4 + $0xd58] sm:$0xff]  ;;  %v493_v45 = vld [vmem:[#allocation4 + $0xdd0] sm:$0xff] }
  0xc7   :  { %2144 = vmatpush3.msra.mxu1 %v412_v47  ;;  %2110 = vmatprep.subr.mxu0 %v395_v48  ;;  %v445_v46 = vld [vmem:[#allocation4 + $0xc50] sm:$0xff]  ;;  %v460_v48 = vld [vmem:[#allocation4 + $0xcc8] sm:$0xff] }
  0xc8   :  { %2145 = vmatprep.subr.mxu1 %v427_v49  ;;  %2111 = vmatpush3.msra.mxu0 %v379_v50  ;;  %v477_v47 = vld [vmem:[#allocation4 + $0xd50] sm:$0xff]  ;;  %v492_v49 = vld [vmem:[#allocation4 + $0xdc8] sm:$0xff] }
  0xc9   :  { %2146 = vmatpush3.msra.mxu1 %v411_v51  ;;  %2112 = vmatprep.subr.mxu0 %v394_v52  ;;  %v444_v50 = vld [vmem:[#allocation4 + $0xc48] sm:$0xff]  ;;  %v459_v52 = vld [vmem:[#allocation4 + $0xcc0] sm:$0xff] }
  0xca   :  { %2147 = vmatprep.subr.mxu1 %v426_v53  ;;  %2113 = vmatpush3.msra.mxu0 %v378_v54  ;;  %v476_v51 = vld [vmem:[#allocation4 + $0xd48] sm:$0xff]  ;;  %v491_v53 = vld [vmem:[#allocation4 + $0xdc0] sm:$0xff] }
  0xcb   :  { %2148 = vmatpush3.msra.mxu1 %v410_v55  ;;  %2114 = vmatprep.subr.mxu0 %v393_v56  ;;  %v443_v54 = vld [vmem:[#allocation4 + $0xc40] sm:$0xff]  ;;  %v458_v56 = vld [vmem:[#allocation4 + $0xcb8] sm:$0xff] }
  0xcc   :  { %2149 = vmatprep.subr.mxu1 %v425_v57  ;;  %2115 = vmatpush3.msra.mxu0 %v377_v58  ;;  %v475_v55 = vld [vmem:[#allocation4 + $0xd40] sm:$0xff]  ;;  %v490_v57 = vld [vmem:[#allocation4 + $0xdb8] sm:$0xff] }
  0xcd   :  { %2150 = vmatpush3.msra.mxu1 %v409_v59  ;;  %2116 = vmatprep.subr.mxu0 %v392_v60  ;;  %v442_v58 = vld [vmem:[#allocation4 + $0xc38] sm:$0xff]  ;;  %v457_v60 = vld [vmem:[#allocation4 + $0xcb0] sm:$0xff] }
  0xce   :  { %2151 = vmatprep.subr.mxu1 %v424_v61  ;;  %2117 = vmatpush3.msra.mxu0 %v376_v62  ;;  %v474_v59 = vld [vmem:[#allocation4 + $0xd38] sm:$0xff]  ;;  %v489_v61 = vld [vmem:[#allocation4 + $0xdb0] sm:$0xff] }
  0xcf   :  { %2152 = vmatpush3.msra.mxu1 %v408_v63  ;;  %2118 = vmatprep.subr.mxu0 %v391_v0  ;;  %v441_v62 = vld [vmem:[#allocation4 + $0xc30] sm:$0xff]  ;;  %v456_v0 = vld [vmem:[#allocation4 + $0xca8] sm:$0xff] }
  0xd0   :  { %2153 = vmatprep.subr.mxu1 %v423_v1  ;;  %2119 = vmatpush3.msra.mxu0 %v375_v2  ;;  %v473_v63 = vld [vmem:[#allocation4 + $0xd30] sm:$0xff]  ;;  %v488_v1 = vld [vmem:[#allocation4 + $0xda8] sm:$0xff] }
  0xd1   :  { %2154 = vmatpush3.msra.mxu1 %v407_v3  ;;  %2120 = vmatprep.subr.mxu0 %v390_v4  ;;  %v440_v2 = vld [vmem:[#allocation4 + $0xc28] sm:$0xff]  ;;  %v455_v4 = vld [vmem:[#allocation4 + $0xca0] sm:$0xff] }
  0xd2   :  { %2155 = vmatprep.subr.mxu1 %v422_v5  ;;  %2121 = vmatpush3.msra.mxu0 %v374_v6  ;;  %v472_v3 = vld [vmem:[#allocation4 + $0xd28] sm:$0xff]  ;;  %v487_v5 = vld [vmem:[#allocation4 + $0xda0] sm:$0xff] }
  0xd3   :  { %2156 = vmatpush3.msra.mxu1 %v406_v7  ;;  %2122 = vmatprep.subr.mxu0 %v389_v8  ;;  %v439_v6 = vld [vmem:[#allocation4 + $0xc20] sm:$0xff]  ;;  %v454_v8 = vld [vmem:[#allocation4 + $0xc98] sm:$0xff] }
  0xd4   :  { %2157 = vmatprep.subr.mxu1 %v421_v9  ;;  %2123 = vmatpush3.msra.mxu0 %v373_v10  ;;  %v471_v7 = vld [vmem:[#allocation4 + $0xd20] sm:$0xff]  ;;  %v486_v9 = vld [vmem:[#allocation4 + $0xd98] sm:$0xff] }
  0xd5   :  { %2158 = vmatpush3.msra.mxu1 %v405_v11  ;;  %2124 = vmatprep.subr.mxu0 %v388_v13  ;;  %v438_v10 = vld [vmem:[#allocation4 + $0xc18] sm:$0xff]  ;;  %v485_v13 = vld [vmem:[#allocation4 + $0xd90] sm:$0xff] }
  0xd6   :  { %2159 = vmatprep.subr.mxu1 %v420_v14  ;;  %2125 = vmatpush3.msra.mxu0 %v372_v15  ;;  %v470_v11 = vld [vmem:[#allocation4 + $0xd18] sm:$0xff]  ;;  %v437_v14 = vld [vmem:[#allocation4 + $0xc10] sm:$0xff] }
  0xd7   :  { %2160 = vmatpush3.msra.mxu1 %v404_v16  ;;  %2126 = vmatprep.subr.mxu0 %v387_v18  ;;  %v469_v15 = vld [vmem:[#allocation4 + $0xd10] sm:$0xff]  ;;  %v47_v16 = vld [vmem:[%s2429_s0 + $0x60] sm:$0xff]  ;;  %v484_v18 = vld [vmem:[#allocation4 + $0xd88] sm:$0xff] }
  0xd8   :  { %2161 = vmatprep.subr.mxu1 %v419_v19  ;;  %2127 = vmatpush3.msra.mxu0 %v371_v21  ;;  %v436_v19 = vld [vmem:[#allocation4 + $0xc08] sm:$0xff] }
  0xd9   :  { %1375 = vmatprep.mubr.f32.mxu0 %v589_v20  ;;  %2162 = vmatpush3.msra.mxu1 %v403_v22  ;;  %v468_v20 = vld [vmem:[#allocation4 + $0xd08] sm:$0xff]  ;;  %v451_v22 = vld [vmem:[#allocation4 + $0xc80] sm:$0xff] }
  0xda   :  { %1376 = vmatmul.mubr.f32.vlgmr.msra.gmra.mxu0 %v45_v12  ;;  %1445 = vmatprep.mubr.f32.mxu1 %v590_v23  ;;  %v453_v12 = vld [vmem:[#allocation4 + $0xc90] sm:$0xff]  ;;  %v48_v21 = vld [vmem:[%s2429_s0 + $0x68] sm:$0xff] }
  0xdb   :  { %2166 = vmatprep.subr.mxu0 %v466_v24  ;;  %2201 = vmatprep.subr.mxu1 %v498_v25  ;;  %v483_v23 = vld [vmem:[#allocation4 + $0xd80] sm:$0xff]  ;;  %v591_v24 = vcombine.high %v47_v16, %v47_v16 }
  0xdc   :  { %1446 = vmatmul.mubr.f32.vlgmr.msra.gmra.mxu1 %v46_v17  ;;  %2167 = vmatpush3.msra.mxu0 %v450_v26  ;;  %v452_v17 = vld [vmem:[#allocation4 + $0xc88] sm:$0xff]  ;;  %v435_v25 = vld [vmem:[#allocation4 + $0xc00] sm:$0xff] }
  0xdd   :  { %2202 = vmatpush3.msra.mxu1 %v482_v27  ;;  %2168 = vmatprep.subr.mxu0 %v465_v28  ;;  %v467_v26 = vld [vmem:[#allocation4 + $0xd00] sm:$0xff]  ;;  %v592_v27 = vcombine.high %v48_v21, %v48_v21  ;;  %v530_v28 = vld [vmem:[#allocation4 + $0xef8] sm:$0xff] }
  0xde   :  { %2203 = vmatprep.subr.mxu1 %v497_v29  ;;  %2169 = vmatpush3.msra.mxu0 %v449_v30  ;;  %v562_v29 = vld [vmem:[#allocation4 + $0xff8] sm:$0xff] }
  0xdf   :  { %2204 = vmatpush3.msra.mxu1 %v481_v31  ;;  %2170 = vmatprep.subr.mxu0 %v464_v32  ;;  %v514_v30 = vld [vmem:[#allocation4 + $0xe78] sm:$0xff]  ;;  %v529_v32 = vld [vmem:[#allocation4 + $0xef0] sm:$0xff] }
  0xe0   :  { %2205 = vmatprep.subr.mxu1 %v496_v33  ;;  %2171 = vmatpush3.msra.mxu0 %v448_v34  ;;  %v546_v31 = vld [vmem:[#allocation4 + $0xf78] sm:$0xff]  ;;  %v561_v33 = vld [vmem:[#allocation4 + $0xff0] sm:$0xff] }
  0xe1   :  { %2206 = vmatpush3.msra.mxu1 %v480_v35  ;;  %2172 = vmatprep.subr.mxu0 %v463_v36  ;;  %v513_v34 = vld [vmem:[#allocation4 + $0xe70] sm:$0xff]  ;;  %v528_v36 = vld [vmem:[#allocation4 + $0xee8] sm:$0xff] }
  0xe2   :  { %2207 = vmatprep.subr.mxu1 %v495_v37  ;;  %2173 = vmatpush3.msra.mxu0 %v447_v38  ;;  %v545_v35 = vld [vmem:[#allocation4 + $0xf70] sm:$0xff]  ;;  %v560_v37 = vld [vmem:[#allocation4 + $0xfe8] sm:$0xff] }
  0xe3   :  { %2208 = vmatpush3.msra.mxu1 %v479_v39  ;;  %2174 = vmatprep.subr.mxu0 %v462_v40  ;;  %v512_v38 = vld [vmem:[#allocation4 + $0xe68] sm:$0xff]  ;;  %v527_v40 = vld [vmem:[#allocation4 + $0xee0] sm:$0xff] }
  0xe4   :  { %2209 = vmatprep.subr.mxu1 %v494_v41  ;;  %2175 = vmatpush3.msra.mxu0 %v446_v42  ;;  %v544_v39 = vld [vmem:[#allocation4 + $0xf68] sm:$0xff]  ;;  %v559_v41 = vld [vmem:[#allocation4 + $0xfe0] sm:$0xff] }
  0xe5   :  { %2210 = vmatpush3.msra.mxu1 %v478_v43  ;;  %2176 = vmatprep.subr.mxu0 %v461_v44  ;;  %v511_v42 = vld [vmem:[#allocation4 + $0xe60] sm:$0xff]  ;;  %v526_v44 = vld [vmem:[#allocation4 + $0xed8] sm:$0xff] }
  0xe6   :  { %2211 = vmatprep.subr.mxu1 %v493_v45  ;;  %2177 = vmatpush3.msra.mxu0 %v445_v46  ;;  %v543_v43 = vld [vmem:[#allocation4 + $0xf60] sm:$0xff]  ;;  %v558_v45 = vld [vmem:[#allocation4 + $0xfd8] sm:$0xff] }
  0xe7   :  { %2212 = vmatpush3.msra.mxu1 %v477_v47  ;;  %2178 = vmatprep.subr.mxu0 %v460_v48  ;;  %v510_v46 = vld [vmem:[#allocation4 + $0xe58] sm:$0xff]  ;;  %v525_v48 = vld [vmem:[#allocation4 + $0xed0] sm:$0xff] }
  0xe8   :  { %2213 = vmatprep.subr.mxu1 %v492_v49  ;;  %2179 = vmatpush3.msra.mxu0 %v444_v50  ;;  %v542_v47 = vld [vmem:[#allocation4 + $0xf58] sm:$0xff]  ;;  %v557_v49 = vld [vmem:[#allocation4 + $0xfd0] sm:$0xff] }
  0xe9   :  { %2214 = vmatpush3.msra.mxu1 %v476_v51  ;;  %2180 = vmatprep.subr.mxu0 %v459_v52  ;;  %v509_v50 = vld [vmem:[#allocation4 + $0xe50] sm:$0xff]  ;;  %v524_v52 = vld [vmem:[#allocation4 + $0xec8] sm:$0xff] }
  0xea   :  { %2215 = vmatprep.subr.mxu1 %v491_v53  ;;  %2181 = vmatpush3.msra.mxu0 %v443_v54  ;;  %v541_v51 = vld [vmem:[#allocation4 + $0xf50] sm:$0xff]  ;;  %v556_v53 = vld [vmem:[#allocation4 + $0xfc8] sm:$0xff] }
  0xeb   :  { %2216 = vmatpush3.msra.mxu1 %v475_v55  ;;  %2182 = vmatprep.subr.mxu0 %v458_v56  ;;  %v508_v54 = vld [vmem:[#allocation4 + $0xe48] sm:$0xff]  ;;  %v523_v56 = vld [vmem:[#allocation4 + $0xec0] sm:$0xff] }
  0xec   :  { %2217 = vmatprep.subr.mxu1 %v490_v57  ;;  %2183 = vmatpush3.msra.mxu0 %v442_v58  ;;  %v540_v55 = vld [vmem:[#allocation4 + $0xf48] sm:$0xff]  ;;  %v555_v57 = vld [vmem:[#allocation4 + $0xfc0] sm:$0xff] }
  0xed   :  { %2218 = vmatpush3.msra.mxu1 %v474_v59  ;;  %2184 = vmatprep.subr.mxu0 %v457_v60  ;;  %v507_v58 = vld [vmem:[#allocation4 + $0xe40] sm:$0xff]  ;;  %v522_v60 = vld [vmem:[#allocation4 + $0xeb8] sm:$0xff] }
  0xee   :  { %2219 = vmatprep.subr.mxu1 %v489_v61  ;;  %2185 = vmatpush3.msra.mxu0 %v441_v62  ;;  %v539_v59 = vld [vmem:[#allocation4 + $0xf40] sm:$0xff]  ;;  %v554_v61 = vld [vmem:[#allocation4 + $0xfb8] sm:$0xff] }
  0xef   :  { %2220 = vmatpush3.msra.mxu1 %v473_v63  ;;  %2186 = vmatprep.subr.mxu0 %v456_v0  ;;  %v506_v62 = vld [vmem:[#allocation4 + $0xe38] sm:$0xff]  ;;  %v521_v0 = vld [vmem:[#allocation4 + $0xeb0] sm:$0xff] }
  0xf0   :  { %2221 = vmatprep.subr.mxu1 %v488_v1  ;;  %2187 = vmatpush3.msra.mxu0 %v440_v2  ;;  %v538_v63 = vld [vmem:[#allocation4 + $0xf38] sm:$0xff]  ;;  %v553_v1 = vld [vmem:[#allocation4 + $0xfb0] sm:$0xff] }
  0xf1   :  { %2222 = vmatpush3.msra.mxu1 %v472_v3  ;;  %2188 = vmatprep.subr.mxu0 %v455_v4  ;;  %v505_v2 = vld [vmem:[#allocation4 + $0xe30] sm:$0xff]  ;;  %v520_v4 = vld [vmem:[#allocation4 + $0xea8] sm:$0xff] }
  0xf2   :  { %2223 = vmatprep.subr.mxu1 %v487_v5  ;;  %2189 = vmatpush3.msra.mxu0 %v439_v6  ;;  %v537_v3 = vld [vmem:[#allocation4 + $0xf30] sm:$0xff]  ;;  %v552_v5 = vld [vmem:[#allocation4 + $0xfa8] sm:$0xff] }
  0xf3   :  { %2224 = vmatpush3.msra.mxu1 %v471_v7  ;;  %2190 = vmatprep.subr.mxu0 %v454_v8  ;;  %v504_v6 = vld [vmem:[#allocation4 + $0xe28] sm:$0xff]  ;;  %v519_v8 = vld [vmem:[#allocation4 + $0xea0] sm:$0xff] }
  0xf4   :  { %2225 = vmatprep.subr.mxu1 %v486_v9  ;;  %2191 = vmatpush3.msra.mxu0 %v438_v10  ;;  %v536_v7 = vld [vmem:[#allocation4 + $0xf28] sm:$0xff]  ;;  %v551_v9 = vld [vmem:[#allocation4 + $0xfa0] sm:$0xff] }
  0xf5   :  { %2226 = vmatpush3.msra.mxu1 %v470_v11  ;;  %2192 = vmatprep.subr.mxu0 %v453_v12  ;;  %v503_v10 = vld [vmem:[#allocation4 + $0xe20] sm:$0xff]  ;;  %v518_v12 = vld [vmem:[#allocation4 + $0xe98] sm:$0xff] }
  0xf6   :  { %2227 = vmatprep.subr.mxu1 %v485_v13  ;;  %2193 = vmatpush3.msra.mxu0 %v437_v14  ;;  %v535_v11 = vld [vmem:[#allocation4 + $0xf20] sm:$0xff]  ;;  %v550_v13 = vld [vmem:[#allocation4 + $0xf98] sm:$0xff] }
  0xf7   :  { %2228 = vmatpush3.msra.mxu1 %v469_v15  ;;  %2194 = vmatprep.subr.mxu0 %v452_v17  ;;  %v502_v14 = vld [vmem:[#allocation4 + $0xe18] sm:$0xff]  ;;  %v549_v17 = vld [vmem:[#allocation4 + $0xf90] sm:$0xff] }
  0xf8   :  { %2229 = vmatprep.subr.mxu1 %v484_v18  ;;  %2195 = vmatpush3.msra.mxu0 %v436_v19  ;;  %v534_v15 = vld [vmem:[#allocation4 + $0xf18] sm:$0xff]  ;;  %v501_v18 = vld [vmem:[#allocation4 + $0xe10] sm:$0xff] }
  0xf9   :  { %2230 = vmatpush3.msra.mxu1 %v468_v20  ;;  %2196 = vmatprep.subr.mxu0 %v451_v22  ;;  %v533_v19 = vld [vmem:[#allocation4 + $0xf10] sm:$0xff]  ;;  %v548_v22 = vld [vmem:[#allocation4 + $0xf88] sm:$0xff] }
  0xfa   :  { %2231 = vmatprep.subr.mxu1 %v483_v23  ;;  %2197 = vmatpush3.msra.mxu0 %v435_v25  ;;  %v49_v20 = vld [vmem:[%s2429_s0 + $0x70] sm:$0xff]  ;;  %v50_v23 = vld [vmem:[%s2429_s0 + $0x78] sm:$0xff] }
  0xfb   :  { %1515 = vmatprep.mubr.f32.mxu0 %v591_v24  ;;  %2232 = vmatpush3.msra.mxu1 %v467_v26  ;;  %v500_v24 = vld [vmem:[#allocation4 + $0xe08] sm:$0xff]  ;;  %v515_v26 = vld [vmem:[#allocation4 + $0xe80] sm:$0xff] }
  0xfc   :  { %1516 = vmatmul.mubr.f32.vlgmr.msra.gmra.mxu0 %v47_v16  ;;  %1585 = vmatprep.mubr.f32.mxu1 %v592_v27  ;;  %v517_v16 = vld [vmem:[#allocation4 + $0xe90] sm:$0xff]  ;;  %v532_v25 = vld [vmem:[#allocation4 + $0xf08] sm:$0xff]  ;;  %v547_v27 = vld [vmem:[#allocation4 + $0xf80] sm:$0xff] }
  0xfd   :  { %2236 = vmatprep.subr.mxu0 %v530_v28  ;;  %2271 = vmatprep.subr.mxu1 %v562_v29  ;;  %v593_v28 = vcombine.high %v49_v20, %v49_v20  ;;  %v499_v29 = vld [vmem:[#allocation4 + $0xe00] sm:$0xff] }
  0xfe   :  { %1586 = vmatmul.mubr.f32.vlgmr.msra.gmra.mxu1 %v48_v21  ;;  %2237 = vmatpush3.msra.mxu0 %v514_v30  ;;  %v516_v21 = vld [vmem:[#allocation4 + $0xe88] sm:$0xff]  ;;  %v594_v30 = vcombine.high %v50_v23, %v50_v23 }
  0xff   :  { %2272 = vmatpush3.msra.mxu1 %v546_v31  ;;  %2238 = vmatprep.subr.mxu0 %v529_v32  ;;  %v531_v31 = vld [vmem:[#allocation4 + $0xf00] sm:$0xff]  ;;  %v2351_v32 = vmov 0.0  }
 0x100   :  { %2273 = vmatprep.subr.mxu1 %v561_v33  ;;  %2239 = vmatpush3.msra.mxu0 %v513_v34  ;;  %33 = vst [vmem:[#allocation2] sm:$0xf] %v2351_v32  ;;  %v1778_v33 = vpop.f32.mrf.mxu0  ;;  %v1813_v34 = vpop.f32.mrf.mxu1 }
 0x101   :  { %2274 = vmatpush3.msra.mxu1 %v545_v35  ;;  %2240 = vmatprep.subr.mxu0 %v528_v36 }
 0x102   :  { %2275 = vmatprep.subr.mxu1 %v560_v37  ;;  %2241 = vmatpush3.msra.mxu0 %v512_v38  ;;  %v1779_v35 = vpop.f32.mrf.mxu0  ;;  %v1814_v37 = vpop.f32.mrf.mxu1 }
 0x103   :  { %2276 = vmatpush3.msra.mxu1 %v544_v39  ;;  %2242 = vmatprep.subr.mxu0 %v527_v40  ;;  %v1780_v40 = vadd.f32 %v1779_v35, %v1778_v33 }
 0x104   :  { %2277 = vmatprep.subr.mxu1 %v559_v41  ;;  %2243 = vmatpush3.msra.mxu0 %v511_v42  ;;  %v1815_v41 = vadd.f32 %v1814_v37, %v1813_v34  ;;  %v1738_v34 = vstv %s2431_s2 }
 0x105   :  { %2278 = vmatpush3.msra.mxu1 %v543_v43  ;;  %2244 = vmatprep.subr.mxu0 %v526_v44 }
 0x106   :  { %2279 = vmatprep.subr.mxu1 %v558_v45  ;;  %2245 = vmatpush3.msra.mxu0 %v510_v46  ;;  %v748_v45 = vadd.f32 %v1815_v41, %v1780_v40 }
 0x107   :  { %2280 = vmatpush3.msra.mxu1 %v542_v47  ;;  %2246 = vmatprep.subr.mxu0 %v525_v48 }
 0x108   :  { %2281 = vmatprep.subr.mxu1 %v557_v49  ;;  %2247 = vmatpush3.msra.mxu0 %v509_v50 }
 0x109   :  { %2282 = vmatpush3.msra.mxu1 %v541_v51  ;;  %2248 = vmatprep.subr.mxu0 %v524_v52 }
 0x10a   :  { %2283 = vmatprep.subr.mxu1 %v556_v53  ;;  %2249 = vmatpush3.msra.mxu0 %v508_v54 }
 0x10b   :  { %2284 = vmatpush3.msra.mxu1 %v540_v55  ;;  %2250 = vmatprep.subr.mxu0 %v523_v56 }
 0x10c   :  { %2285 = vmatprep.subr.mxu1 %v555_v57  ;;  %2251 = vmatpush3.msra.mxu0 %v507_v58 }
 0x10d   :  { %2286 = vmatpush3.msra.mxu1 %v539_v59  ;;  %2252 = vmatprep.subr.mxu0 %v522_v60 }
 0x10e   :  { %2287 = vmatprep.subr.mxu1 %v554_v61  ;;  %2253 = vmatpush3.msra.mxu0 %v506_v62 }
 0x10f   :  { %2288 = vmatpush3.msra.mxu1 %v538_v63  ;;  %2254 = vmatprep.subr.mxu0 %v521_v0 }
 0x110   :  { %2289 = vmatprep.subr.mxu1 %v553_v1  ;;  %2255 = vmatpush3.msra.mxu0 %v505_v2 }
 0x111   :  { %2290 = vmatpush3.msra.mxu1 %v537_v3  ;;  %2256 = vmatprep.subr.mxu0 %v520_v4 }
 0x112   :  { %2291 = vmatprep.subr.mxu1 %v552_v5  ;;  %2257 = vmatpush3.msra.mxu0 %v504_v6  ;;  %v1848_v36 = vpop.f32.mrf.mxu0 }
 0x113   :  { %2292 = vmatpush3.msra.mxu1 %v536_v7  ;;  %2258 = vmatprep.subr.mxu0 %v519_v8 }
 0x114   :  { %2293 = vmatprep.subr.mxu1 %v551_v9  ;;  %2259 = vmatpush3.msra.mxu0 %v503_v10  ;;  %v1883_v38 = vpop.f32.mrf.mxu1  ;;  %v1849_v39 = vpop.f32.mrf.mxu0 }
 0x115   :  { %2294 = vmatpush3.msra.mxu1 %v535_v11  ;;  %2260 = vmatprep.subr.mxu0 %v518_v12  ;;  %v1850_v43 = vadd.f32 %v1849_v39, %v1848_v36 }
 0x116   :  { %2295 = vmatprep.subr.mxu1 %v550_v13  ;;  %2261 = vmatpush3.msra.mxu0 %v502_v14  ;;  %v1884_v44 = vpop.f32.mrf.mxu1 }
 0x117   :  { %2296 = vmatpush3.msra.mxu1 %v534_v15  ;;  %2262 = vmatprep.subr.mxu0 %v517_v16  ;;  %v818_v48 = vadd.f32 %v1850_v43, %v748_v45  ;;  %v1885_v49 = vadd.f32 %v1884_v44, %v1883_v38 }
 0x118   :  { %2297 = vmatprep.subr.mxu1 %v549_v17  ;;  %2263 = vmatpush3.msra.mxu0 %v501_v18 }
 0x119   :  { %2298 = vmatpush3.msra.mxu1 %v533_v19  ;;  %2264 = vmatprep.subr.mxu0 %v516_v21  ;;  %v888_v53 = vadd.f32 %v1885_v49, %v818_v48 }
 0x11a   :  { %2299 = vmatprep.subr.mxu1 %v548_v22  ;;  %2265 = vmatpush3.msra.mxu0 %v500_v24 }
 0x11b   :  { %2300 = vmatpush3.msra.mxu1 %v532_v25  ;;  %2266 = vmatprep.subr.mxu0 %v515_v26 }
 0x11c   :  { %2301 = vmatprep.subr.mxu1 %v547_v27  ;;  %2267 = vmatpush3.msra.mxu0 %v499_v29 }
 0x11d   :  { %1655 = vmatprep.mubr.f32.mxu0 %v593_v28  ;;  %2302 = vmatpush3.msra.mxu1 %v531_v31  ;;  %v34_v31 = vld [vmem:[#allocation2] sm:$0xf] }
 0x11e   :  { %1725 = vmatprep.mubr.f32.mxu1 %v594_v30  ;;  %1656 = vmatmul.mubr.f32.vlgmr.msra.gmra.mxu0 %v49_v20 }
 0x11f   :  { %1726 = vmatmul.mubr.f32.vlgmr.msra.gmra.mxu1 %v50_v23 }
 0x134   :  { %v1918_v42 = vpop.f32.mrf.mxu0 }
 0x136   :  { %v1953_v46 = vpop.f32.mrf.mxu1  ;;  %v1919_v47 = vpop.f32.mrf.mxu0 }
 0x137   :  { %v1920_v51 = vadd.f32 %v1919_v47, %v1918_v42 }
 0x138   :  { %v1954_v52 = vpop.f32.mrf.mxu1 }
 0x139   :  { %v958_v56 = vadd.f32 %v1920_v51, %v888_v53  ;;  %v1955_v57 = vadd.f32 %v1954_v52, %v1953_v46 }
 0x13b   :  { %v1028_v61 = vadd.f32 %v1955_v57, %v958_v56 }
 0x156   :  { %v1988_v50 = vpop.f32.mrf.mxu0 }
 0x158   :  { %v2023_v54 = vpop.f32.mrf.mxu1  ;;  %v1989_v55 = vpop.f32.mrf.mxu0 }
 0x159   :  { %v1990_v59 = vadd.f32 %v1989_v55, %v1988_v50 }
 0x15a   :  { %v2024_v60 = vpop.f32.mrf.mxu1 }
 0x15b   :  { %v1098_v0 = vadd.f32 %v1990_v59, %v1028_v61  ;;  %v2025_v1 = vadd.f32 %v2024_v60, %v2023_v54 }
 0x15d   :  { %v1168_v5 = vadd.f32 %v2025_v1, %v1098_v0 }
 0x178   :  { %v2058_v58 = vpop.f32.mrf.mxu0 }
 0x17a   :  { %v2093_v62 = vpop.f32.mrf.mxu1  ;;  %v2059_v63 = vpop.f32.mrf.mxu0 }
 0x17b   :  { %v2060_v3 = vadd.f32 %v2059_v63, %v2058_v58 }
 0x17c   :  { %v2094_v4 = vpop.f32.mrf.mxu1 }
 0x17d   :  { %v1238_v8 = vadd.f32 %v2060_v3, %v1168_v5  ;;  %v2095_v9 = vadd.f32 %v2094_v4, %v2093_v62 }
 0x17f   :  { %v1308_v13 = vadd.f32 %v2095_v9, %v1238_v8 }
 0x19a   :  { %v2128_v2 = vpop.f32.mrf.mxu0 }
 0x19c   :  { %v2163_v6 = vpop.f32.mrf.mxu1  ;;  %v2129_v7 = vpop.f32.mrf.mxu0 }
 0x19d   :  { %v2130_v11 = vadd.f32 %v2129_v7, %v2128_v2 }
 0x19e   :  { %v2164_v12 = vpop.f32.mrf.mxu1 }
 0x19f   :  { %v1378_v16 = vadd.f32 %v2130_v11, %v1308_v13  ;;  %v2165_v17 = vadd.f32 %v2164_v12, %v2163_v6 }
 0x1a1   :  { %v1448_v20 = vadd.f32 %v2165_v17, %v1378_v16 }
 0x1bc   :  { %v2198_v10 = vpop.f32.mrf.mxu0 }
 0x1be   :  { %v2233_v14 = vpop.f32.mrf.mxu1  ;;  %v2199_v15 = vpop.f32.mrf.mxu0 }
 0x1bf   :  { %v2200_v18 = vadd.f32 %v2199_v15, %v2198_v10 }
 0x1c0   :  { %v2234_v19 = vpop.f32.mrf.mxu1 }
 0x1c1   :  { %v1518_v21 = vadd.f32 %v2200_v18, %v1448_v20  ;;  %v2235_v22 = vadd.f32 %v2234_v19, %v2233_v14 }
 0x1c3   :  { %v1588_v27 = vadd.f32 %v2235_v22, %v1518_v21 }
 0x1de   :  { %v2268_v23 = vpop.f32.mrf.mxu0 }
 0x1df   :  { %v2303_v24 = vpop.f32.mrf.mxu1 }
 0x1e0   :  { %v2269_v25 = vpop.f32.mrf.mxu0 }
 0x1e1   :  { %v2304_v26 = vpop.f32.mrf.mxu1  ;;  %v2270_v28 = vadd.f32 %v2269_v25, %v2268_v23 }
 0x1e2   :  { %v2305_v30 = vadd.f32 %v2304_v26, %v2303_v24 }
 0x1e3   :  { %v1658_v29 = vadd.f32 %v2270_v28, %v1588_v27 }
 0x1e5   :  { %v1728_v32 = vadd.f32 %v2305_v30, %v1658_v29 }
 0x1e7   :  { %v1731_v33 = vadd.f32 %v1728_v32, %v34_v31 }
 0x1e9   :  { %1732 = vst [vmem:[#allocation2] sm:$0xf] %v1731_v33 }
 0x1f0   :  { %v1736_v35 = vld [vmem:[#allocation2] sm:$0xf] }
 0x1f1   :  { %v1739_v36 = vadd.f32 %v1738_v34, %v1736_v35 }
 0x1f3   :  { %1740 = vst [vmem:[%s2432_s3] sm:$0xf] %v1739_v36 }
 0x1f4   :  { %1745 = vsyncpa [#allocation5], 1 }

</bundles_post_ra>
